<compile_context>
chip_gen: v7x
topology: tpu7x:2x2x1
jax: 0.10.0
libtpu: 0.0.40
codegen_flags: <defaults>
</compile_context>

<pallas_src>
import functools

import jax
import jax.numpy as jnp
from jax import lax
from jax.experimental import pallas as pl
from jax.experimental.pallas import tpu as pltpu

EPS = 1e-5
NEG_INF = -1e30


def _vmem_limit_bytes():
    """Per-generation VMEM budget: ~7/8 of physical, capped at 100 MiB.

    v5e/v6e (128 MiB physical) -> 100 MiB; v7x (64 MiB per TC) -> 56 MiB.
    """
    default = 64 * 1024 * 1024
    try:
        cap = int(pltpu.get_tpu_info().vmem_capacity_bytes)
    except Exception:
        return default
    return min(cap * 7 // 8, 100 * 1024 * 1024)


def _layernorm(h, g, b):
    # two-pass (centered) variance: closer to PyTorch LayerNorm numerics.
    mu = jnp.mean(h, axis=-1, keepdims=True)
    c = h - mu
    var = jnp.mean(c * c, axis=-1, keepdims=True)
    return c * lax.rsqrt(var + EPS) * g + b


# ---------------------------------------------------------------------------
# Kernel 1: fused transformer layer stack.
#   grid = (batch_chunks, n_layers); residual stream lives in VMEM scratch.
# ---------------------------------------------------------------------------
def _layers_kernel(x_ref, g1_ref, b1_ref, wqkv_ref, wo_ref, g2_ref, b2_ref,
                   w1_ref, w2_ref, gf_ref, bf_ref, o_ref, acc_ref, mask_ref,
                   *, Bc, T, n_heads, head_size):
    l = pl.program_id(1)
    L = pl.num_programs(1)
    H, Dh = n_heads, head_size
    HD = H * Dh

    @pl.when(l == 0)
    def _():
        # residual stream init + causal additive mask (built once, reused
        # by every layer of this batch chunk).
        acc_ref[...] = x_ref[...].astype(jnp.float32)
        row = lax.broadcasted_iota(jnp.int32, (T, T), 0)
        col = lax.broadcasted_iota(jnp.int32, (T, T), 1)
        mask_ref[...] = jnp.where(col <= row, 0.0, NEG_INF).astype(jnp.float32)

    x = acc_ref[...]                                      # (Bc*T, C) f32

    # ---------------- attention branch ----------------
    h = _layernorm(x, g1_ref[0], b1_ref[0])
    qkv = jnp.dot(h.astype(jnp.bfloat16), wqkv_ref[0],
                  preferred_element_type=jnp.float32)     # (Bc*T, 3*HD)

    def split_heads(t2d):
        # (Bc*T, H*Dh) -> (Bc*H, T, Dh); single reshape + transpose
        # (mirrors torch's .reshape(B,T,H,Dh).permute -> (B,H,T,Dh)).
        t4 = t2d.reshape(Bc, T, H, Dh)
        return jnp.transpose(t4, (0, 2, 1, 3)).reshape(Bc * H, T, Dh)

    # NOTE: qkv columns are packed [Q | K | V], each head-major, matching the
    # Torch reshape(B,T,3,H,Dh).  The 1/sqrt(Dh) softmax scale is already
    # folded into the Q weight columns at parameter-prep time.
    qh = split_heads(qkv[:, :HD]).astype(jnp.bfloat16)
    kh = split_heads(qkv[:, HD:2 * HD]).astype(jnp.bfloat16)
    vh = split_heads(qkv[:, 2 * HD:]).astype(jnp.bfloat16)

    s = jnp.einsum('zqd,zkd->zqk', qh, kh,
                   preferred_element_type=jnp.float32)    # (Bc*H, T, T)
    s = s + mask_ref[...]                                 # broadcast (T,T)

    m = jnp.max(s, axis=-1, keepdims=True)
    p = jnp.exp(s - m)
    denom = jnp.sum(p, axis=-1, keepdims=True)
    p = p * pl.reciprocal(denom, approx=True)

    o = jnp.einsum('zqk,zkd->zqd', p.astype(jnp.bfloat16), vh,
                   preferred_element_type=jnp.float32)    # (Bc*H, T, Dh)

    # merge heads back: (Bc*H, T, Dh) -> (Bc*T, H*Dh); single layout op.
    o_cat = jnp.transpose(o.reshape(Bc, H, T, Dh),
                          (0, 2, 1, 3)).reshape(Bc * T, HD)

    attn = jnp.dot(o_cat.astype(jnp.bfloat16), wo_ref[0],
                   preferred_element_type=jnp.float32)    # (Bc*T, C)
    x1 = x + attn

    # ---------------- MLP branch ----------------
    h2 = _layernorm(x1, g2_ref[0], b2_ref[0])
    y = jnp.dot(h2.astype(jnp.bfloat16), w1_ref[0],
                preferred_element_type=jnp.float32)
    y = jnp.maximum(y, 0.0)
    y = jnp.dot(y.astype(jnp.bfloat16), w2_ref[0],
                preferred_element_type=jnp.float32)
    x2 = x1 + y
    acc_ref[...] = x2

    # ---------------- final LN on the last layer step ----------------
    @pl.when(l == L - 1)
    def _():
        o_ref[...] = _layernorm(x2, gf_ref[...], bf_ref[...]).astype(o_ref.dtype)


def fused_layers(x_flat, params, *, B, T, n_heads, head_size):
    BT, C = x_flat.shape
    L = params["wqkv"].shape[0]
    # batch chunks for megacore (v7x has 2 TensorCores); attention is
    # per-sequence so the split is safe.
    NB = 2 if (B % 2 == 0 and B >= 2) else 1
    Bc = B // NB

    kernel = functools.partial(_layers_kernel, Bc=Bc, T=T,
                               n_heads=n_heads, head_size=head_size)

    def per_layer(shape):
        nd = len(shape)
        return pl.BlockSpec((1,) + tuple(shape[1:]),
                            lambda b, l, nd=nd: (l,) + (0,) * (nd - 1))

    def const(shape):
        nd = len(shape)
        return pl.BlockSpec(tuple(shape),
                            lambda b, l, nd=nd: (0,) * nd)

    return pl.pallas_call(
        kernel,
        out_shape=jax.ShapeDtypeStruct((BT, C), jnp.bfloat16),
        grid_spec=pltpu.PrefetchScalarGridSpec(
            num_scalar_prefetch=0,
            grid=(NB, L),
            in_specs=[
                pl.BlockSpec((Bc * T, C), lambda b, l: (b, 0)),   # x (per chunk)
                per_layer(params["ln1_g"].shape),
                per_layer(params["ln1_b"].shape),
                per_layer(params["wqkv"].shape),
                per_layer(params["wo"].shape),
                per_layer(params["ln2_g"].shape),
                per_layer(params["ln2_b"].shape),
                per_layer(params["w1"].shape),
                per_layer(params["w2"].shape),
                const(params["lnf_g"].shape),
                const(params["lnf_b"].shape),
            ],
            out_specs=pl.BlockSpec((Bc * T, C), lambda b, l: (b, 0)),
            scratch_shapes=[pltpu.VMEM((Bc * T, C), jnp.float32),   # residual
                            pltpu.VMEM((T, T), jnp.float32)],       # causal mask
        ),
        compiler_params=pltpu.CompilerParams(
            dimension_semantics=("parallel", "arbitrary"),
            vmem_limit_bytes=_vmem_limit_bytes(),
        ),
    )(x_flat, params["ln1_g"], params["ln1_b"], params["wqkv"], params["wo"],
      params["ln2_g"], params["ln2_b"], params["w1"], params["w2"],
      params["lnf_g"], params["lnf_b"])


# ---------------------------------------------------------------------------
# Kernel 2: tied lm_head, vocab axis tiled (lane-dense, streamable stores).
# ---------------------------------------------------------------------------
def _lm_head_kernel(h_ref, w_ref, o_ref):
    o_ref[...] = jnp.dot(h_ref[...], w_ref[...],
                         preferred_element_type=jnp.float32).astype(o_ref.dtype)


def lm_head_matmul(hf, lm_wt):
    BT, C = hf.shape
    _, Vp = lm_wt.shape
    tile_v = 512 if Vp % 512 == 0 else (256 if Vp % 256 == 0 else 128)
    tile_v = min(tile_v, Vp)

    return pl.pallas_call(
        _lm_head_kernel,
        out_shape=jax.ShapeDtypeStruct((BT, Vp), jnp.bfloat16),
        grid_spec=pltpu.PrefetchScalarGridSpec(
            num_scalar_prefetch=0,
            grid=(Vp // tile_v,),
            in_specs=[pl.BlockSpec((BT, C), lambda j: (0, 0)),
                      pl.BlockSpec((C, tile_v), lambda j: (0, j))],
            out_specs=pl.BlockSpec((BT, tile_v), lambda j: (0, j)),
        ),
        compiler_params=pltpu.CompilerParams(
            dimension_semantics=("parallel",),
            vmem_limit_bytes=_vmem_limit_bytes(),
        ),
    )(hf, lm_wt)


# ---------------------------------------------------------------------------
# Parameter construction + full forward.
# ---------------------------------------------------------------------------
def init_params(key, vocab_size, context_length, n_layers, n_hidden,
                n_heads, head_size):
    HD = n_heads * head_size
    keys = jax.random.split(key, 2 + 4 * n_layers)
    tok = (0.02 * jax.random.normal(keys[0], (vocab_size, n_hidden))).astype(jnp.bfloat16)
    pos = (0.02 * jax.random.normal(keys[1], (context_length, n_hidden))).astype(jnp.bfloat16)

    # tied lm_head weight: pre-transposed to (C, Vp) with vocab zero-padded to
    # a multiple of 128 (lane-dense logits store; pad sliced off in wrapper).
    vp = ((vocab_size + 127) // 128) * 128
    lm_wt = jnp.zeros((n_hidden, vp), jnp.bfloat16).at[:, :vocab_size].set(tok.T)

    qscale = 1.0 / (head_size ** 0.5)
    wqkv, wo, w1, w2 = [], [], [], []
    for l in range(n_layers):
        k0, k1, k2, k3 = keys[2 + 4 * l: 2 + 4 * (l + 1)]
        w = 0.02 * jax.random.normal(k0, (n_hidden, 3 * HD))
        # Fold the softmax 1/sqrt(head_size) scale into the Q columns.  When
        # importing a real Torch checkpoint, apply the same scaling here.
        w = w.at[:, :HD].multiply(qscale)
        wqkv.append(w.astype(jnp.bfloat16))
        wo.append((0.02 * jax.random.normal(k1, (HD, n_hidden))).astype(jnp.bfloat16))
        w1.append((0.02 * jax.random.normal(k2, (n_hidden, 4 * n_hidden))).astype(jnp.bfloat16))
        w2.append((0.02 * jax.random.normal(k3, (4 * n_hidden, n_hidden))).astype(jnp.bfloat16))

    L = n_layers
    return {
        "tok_emb": tok, "pos_emb": pos, "lm_wt": lm_wt,
        "ln1_g": jnp.ones((L, 1, n_hidden), jnp.float32),
        "ln1_b": jnp.zeros((L, 1, n_hidden), jnp.float32),
        "ln2_g": jnp.ones((L, 1, n_hidden), jnp.float32),
        "ln2_b": jnp.zeros((L, 1, n_hidden), jnp.float32),
        "lnf_g": jnp.ones((1, n_hidden), jnp.float32),
        "lnf_b": jnp.zeros((1, n_hidden), jnp.float32),
        "wqkv": jnp.stack(wqkv), "wo": jnp.stack(wo),
        "w1": jnp.stack(w1), "w2": jnp.stack(w2),
    }


def transformer_forward(ids, params, *, n_heads, head_size):
    B, T = ids.shape
    V, C = params["tok_emb"].shape
    # embedding gather + positional add are plain-JAX glue, flattened to (B*T, C)
    x = params["tok_emb"][ids] + params["pos_emb"][:T][None, :, :]
    x = x.reshape(B * T, C).astype(jnp.bfloat16)

    hf = fused_layers(x, params, B=B, T=T,
                      n_heads=n_heads, head_size=head_size)   # (B*T, C) bf16
    logits_pad = lm_head_matmul(hf, params["lm_wt"])          # (B*T, Vp) bf16
    logits = logits_pad.reshape(B, T, -1)[:, :, :V]
    # TODO(synk): cross-entropy loss (targets is not None) not implemented.
    return logits, None


if __name__ == "__main__":
    vocab_size = 64
    context_length = 16
    n_layers = 2
    n_hidden = 32
    n_heads = 4
    head_size = 8   # n_heads * head_size == n_hidden (required by the module)
    B, T = 2, 8

    key = jax.random.PRNGKey(0)
    pkey, ikey = jax.random.split(key)
    params = init_params(pkey, vocab_size, context_length, n_layers,
                         n_hidden, n_heads, head_size)
    ids = jax.random.randint(ikey, (B, T), 0, vocab_size, dtype=jnp.int32)

    logits, loss = transformer_forward(ids, params,
                                       n_heads=n_heads, head_size=head_size)
    logits = jax.block_until_ready(logits)
    assert logits.shape == (B, T, vocab_size)
    assert bool(jnp.all(jnp.isfinite(logits.astype(jnp.float32))))
    print("KERNEL_OK")
</pallas_src>

<mosaic_0001>
module attributes {stable_mosaic.version = 11 : i64} {
  func.func @_layers_kernel(%arg0: i32, %arg1: i32, %arg2: memref<8x32xbf16, #tpu.memory_space<vmem>>, %arg3: memref<1x1x32xf32, #tpu.memory_space<vmem>>, %arg4: memref<1x1x32xf32, #tpu.memory_space<vmem>>, %arg5: memref<1x32x96xbf16, #tpu.memory_space<vmem>>, %arg6: memref<1x32x32xbf16, #tpu.memory_space<vmem>>, %arg7: memref<1x1x32xf32, #tpu.memory_space<vmem>>, %arg8: memref<1x1x32xf32, #tpu.memory_space<vmem>>, %arg9: memref<1x32x128xbf16, #tpu.memory_space<vmem>>, %arg10: memref<1x128x32xbf16, #tpu.memory_space<vmem>>, %arg11: memref<1x32xf32, #tpu.memory_space<vmem>>, %arg12: memref<1x32xf32, #tpu.memory_space<vmem>>, %arg13: memref<8x32xbf16, #tpu.memory_space<vmem>>, %arg14: memref<8x32xf32, #tpu.memory_space<vmem>>, %arg15: memref<8x8xf32, #tpu.memory_space<vmem>>) attributes {dimension_semantics = [#tpu.dimension_semantics<parallel>, #tpu.dimension_semantics<arbitrary>], iteration_bounds = array<i64: 2, 2>, scalar_prefetch = 0 : i64, scratch_operands = 2 : i64, tpu.core_type = #tpu.core_type<tc>, window_params = [{transform_indices = @transform_0, window_bounds = array<i64: 8, 32>}, {transform_indices = @transform_1, window_bounds = array<i64: 1, 1, 32>}, {transform_indices = @transform_2, window_bounds = array<i64: 1, 1, 32>}, {transform_indices = @transform_3, window_bounds = array<i64: 1, 32, 96>}, {transform_indices = @transform_4, window_bounds = array<i64: 1, 32, 32>}, {transform_indices = @transform_5, window_bounds = array<i64: 1, 1, 32>}, {transform_indices = @transform_6, window_bounds = array<i64: 1, 1, 32>}, {transform_indices = @transform_7, window_bounds = array<i64: 1, 32, 128>}, {transform_indices = @transform_8, window_bounds = array<i64: 1, 128, 32>}, {pipeline_mode = #tpu.pipeline_mode<synchronous>, transform_indices = @transform_9, window_bounds = array<i64: 1, 32>}, {pipeline_mode = #tpu.pipeline_mode<synchronous>, transform_indices = @transform_10, window_bounds = array<i64: 1, 32>}, {transform_indices = @transform_11, window_bounds = array<i64: 8, 32>}]} {
    %c0_i32 = arith.constant 0 : i32
    %0 = arith.cmpi eq, %arg1, %c0_i32 : i32
    %1 = arith.extui %0 : i1 to i32
    %c0_i32_0 = arith.constant 0 : i32
    %2 = arith.cmpi ne, %1, %c0_i32_0 : i32
    scf.if %2 {
      %c0_49 = arith.constant 0 : index
      %c0_50 = arith.constant 0 : index
      %111 = vector.load %arg2[%c0_49, %c0_50] : memref<8x32xbf16, #tpu.memory_space<vmem>>, vector<8x32xbf16>
      %112 = arith.extf %111 : vector<8x32xbf16> to vector<8x32xf32>
      %c0_51 = arith.constant 0 : index
      %c0_52 = arith.constant 0 : index
      %113 = vector.load %arg14[%c0_51, %c0_52] : memref<8x32xf32, #tpu.memory_space<vmem>>, vector<8x32xf32>
      tpu.vector_store %arg14[%c0_51, %c0_52], %112 {strides = array<i32>} : memref<8x32xf32, #tpu.memory_space<vmem>>, vector<8x32xf32>,
      %114 = tpu.iota {dimensions = array<i32: 0>} : vector<8x8xi32>
      %115 = tpu.iota {dimensions = array<i32: 1>} : vector<8x8xi32>
      %116 = arith.cmpi sle, %115, %114 : vector<8x8xi32>
      %cst_53 = arith.constant 0.000000e+00 : f32
      %cst_54 = arith.constant -1.000000e+30 : f32
      %117 = vector.broadcast %cst_53 : f32 to vector<8x8xf32>
      %118 = vector.broadcast %cst_54 : f32 to vector<8x8xf32>
      %119 = arith.select %116, %117, %118 : vector<8x8xi1>, vector<8x8xf32>
      %c0_55 = arith.constant 0 : index
      %c0_56 = arith.constant 0 : index
      %120 = vector.load %arg15[%c0_55, %c0_56] : memref<8x8xf32, #tpu.memory_space<vmem>>, vector<8x8xf32>
      tpu.vector_store %arg15[%c0_55, %c0_56], %119 {strides = array<i32>} : memref<8x8xf32, #tpu.memory_space<vmem>>, vector<8x8xf32>,
    } else {
    }
    %c0 = arith.constant 0 : index
    %c0_1 = arith.constant 0 : index
    %3 = vector.load %arg14[%c0, %c0_1] : memref<8x32xf32, #tpu.memory_space<vmem>>, vector<8x32xf32>
    %c0_2 = arith.constant 0 : index
    %c0_3 = arith.constant 0 : index
    %c0_4 = arith.constant 0 : index
    %4 = vector.load %arg3[%c0_2, %c0_3, %c0_4] : memref<1x1x32xf32, #tpu.memory_space<vmem>>, vector<1x1x32xf32>
    %5 = vector.shape_cast %4 : vector<1x1x32xf32> to vector<1x32xf32>
    %c0_5 = arith.constant 0 : index
    %c0_6 = arith.constant 0 : index
    %c0_7 = arith.constant 0 : index
    %6 = vector.load %arg4[%c0_5, %c0_6, %c0_7] : memref<1x1x32xf32, #tpu.memory_space<vmem>>, vector<1x1x32xf32>
    %7 = vector.shape_cast %6 : vector<1x1x32xf32> to vector<1x32xf32>
    %cst = arith.constant dense<0.000000e+00> : vector<8xf32>
    %8 = vector.multi_reduction <add>, %3, %cst [1] : vector<8x32xf32> to vector<8xf32>
    %9 = vector.shape_cast %8 : vector<8xf32> to vector<8x1xf32>
    %cst_8 = arith.constant 3.200000e+01 : f32
    %10 = vector.broadcast %cst_8 : f32 to vector<8x1xf32>
    %11 = arith.divf %9, %10 : vector<8x1xf32>
    %12 = vector.broadcast %11 : vector<8x1xf32> to vector<8x32xf32>
    %13 = arith.subf %3, %12 : vector<8x32xf32>
    %14 = arith.mulf %13, %13 : vector<8x32xf32>
    %cst_9 = arith.constant dense<0.000000e+00> : vector<8xf32>
    %15 = vector.multi_reduction <add>, %14, %cst_9 [1] : vector<8x32xf32> to vector<8xf32>
    %16 = vector.shape_cast %15 : vector<8xf32> to vector<8x1xf32>
    %cst_10 = arith.constant 3.200000e+01 : f32
    %17 = vector.broadcast %cst_10 : f32 to vector<8x1xf32>
    %18 = arith.divf %16, %17 : vector<8x1xf32>
    %cst_11 = arith.constant 9.99999974E-6 : f32
    %19 = vector.broadcast %cst_11 : f32 to vector<8x1xf32>
    %20 = arith.addf %18, %19 : vector<8x1xf32>
    %21 = math.rsqrt %20 : vector<8x1xf32>
    %22 = vector.broadcast %21 : vector<8x1xf32> to vector<8x32xf32>
    %23 = arith.mulf %13, %22 : vector<8x32xf32>
    %24 = vector.broadcast %5 : vector<1x32xf32> to vector<8x32xf32>
    %25 = arith.mulf %23, %24 : vector<8x32xf32>
    %26 = vector.broadcast %7 : vector<1x32xf32> to vector<8x32xf32>
    %27 = arith.addf %25, %26 : vector<8x32xf32>
    %28 = arith.truncf %27 : vector<8x32xf32> to vector<8x32xbf16>
    %c0_12 = arith.constant 0 : index
    %c0_13 = arith.constant 0 : index
    %c0_14 = arith.constant 0 : index
    %29 = vector.load %arg5[%c0_12, %c0_13, %c0_14] : memref<1x32x96xbf16, #tpu.memory_space<vmem>>, vector<1x32x96xbf16>
    %30 = vector.shape_cast %29 : vector<1x32x96xbf16> to vector<32x96xbf16>
    %cst_15 = arith.constant dense<0.000000e+00> : vector<8x96xf32>
    %31 = tpu.matmul %28, %30, %cst_15 {dimension_numbers = #tpu.dot_dimension_numbers<[1], [0], [0], [1], [0, 0, 1, 1], [], []>} : vector<8x32xbf16>, vector<32x96xbf16>, vector<8x96xf32> -> vector<8x96xf32>
    %32 = vector.extract_strided_slice %31 {offsets = [0, 0], sizes = [8, 32], strides = [1, 1]} : vector<8x96xf32> to vector<8x32xf32>
    %33 = vector.shape_cast %32 : vector<8x32xf32> to vector<1x8x4x8xf32>
    %34 = tpu.transpose %33, [0, 2, 1, 3] : vector<1x8x4x8xf32> -> vector<1x4x8x8xf32>
    %35 = vector.shape_cast %34 : vector<1x4x8x8xf32> to vector<4x8x8xf32>
    %36 = arith.truncf %35 : vector<4x8x8xf32> to vector<4x8x8xbf16>
    %37 = vector.extract_strided_slice %31 {offsets = [0, 32], sizes = [8, 32], strides = [1, 1]} : vector<8x96xf32> to vector<8x32xf32>
    %38 = vector.shape_cast %37 : vector<8x32xf32> to vector<1x8x4x8xf32>
    %39 = tpu.transpose %38, [0, 2, 1, 3] : vector<1x8x4x8xf32> -> vector<1x4x8x8xf32>
    %40 = vector.shape_cast %39 : vector<1x4x8x8xf32> to vector<4x8x8xf32>
    %41 = arith.truncf %40 : vector<4x8x8xf32> to vector<4x8x8xbf16>
    %42 = vector.extract_strided_slice %31 {offsets = [0, 64], sizes = [8, 32], strides = [1, 1]} : vector<8x96xf32> to vector<8x32xf32>
    %43 = vector.shape_cast %42 : vector<8x32xf32> to vector<1x8x4x8xf32>
    %44 = tpu.transpose %43, [0, 2, 1, 3] : vector<1x8x4x8xf32> -> vector<1x4x8x8xf32>
    %45 = vector.shape_cast %44 : vector<1x4x8x8xf32> to vector<4x8x8xf32>
    %46 = arith.truncf %45 : vector<4x8x8xf32> to vector<4x8x8xbf16>
    "tpu.trace_start"() <{level = 10 : i32, message = "zqd,zkd->zqk"}> : () -> ()
    %cst_16 = arith.constant dense<0.000000e+00> : vector<4x8x8xf32>
    %47 = tpu.matmul %36, %41, %cst_16 {dimension_numbers = #tpu.dot_dimension_numbers<[2], [2], [1], [1], [0, 0, 0, 1, 1, 1], [0], [0]>} : vector<4x8x8xbf16>, vector<4x8x8xbf16>, vector<4x8x8xf32> -> vector<4x8x8xf32>
    "tpu.trace_stop"() : () -> ()
    %c0_17 = arith.constant 0 : index
    %c0_18 = arith.constant 0 : index
    %48 = vector.load %arg15[%c0_17, %c0_18] : memref<8x8xf32, #tpu.memory_space<vmem>>, vector<8x8xf32>
    %49 = vector.shape_cast %48 : vector<8x8xf32> to vector<1x8x8xf32>
    %50 = vector.broadcast %49 : vector<1x8x8xf32> to vector<4x8x8xf32>
    %51 = arith.addf %47, %50 : vector<4x8x8xf32>
    %cst_19 = arith.constant dense<0xFF800000> : vector<4x8xf32>
    %52 = vector.multi_reduction <maximumf>, %51, %cst_19 [2] : vector<4x8x8xf32> to vector<4x8xf32>
    %53 = vector.shape_cast %52 : vector<4x8xf32> to vector<4x8x1xf32>
    %54 = vector.broadcast %53 : vector<4x8x1xf32> to vector<4x8x8xf32>
    %55 = arith.subf %51, %54 : vector<4x8x8xf32>
    %56 = math.exp %55 : vector<4x8x8xf32>
    %cst_20 = arith.constant dense<0.000000e+00> : vector<4x8xf32>
    %57 = vector.multi_reduction <add>, %56, %cst_20 [2] : vector<4x8x8xf32> to vector<4x8xf32>
    %58 = vector.shape_cast %57 : vector<4x8xf32> to vector<4x8x1xf32>
    %59 = tpu.reciprocal %58 {approx = true} : vector<4x8x1xf32> -> vector<4x8x1xf32>
    %60 = vector.broadcast %59 : vector<4x8x1xf32> to vector<4x8x8xf32>
    %61 = arith.mulf %56, %60 : vector<4x8x8xf32>
    %62 = arith.truncf %61 : vector<4x8x8xf32> to vector<4x8x8xbf16>
    "tpu.trace_start"() <{level = 10 : i32, message = "zqk,zkd->zqd"}> : () -> ()
    %cst_21 = arith.constant dense<0.000000e+00> : vector<4x8x8xf32>
    %63 = tpu.matmul %62, %46, %cst_21 {dimension_numbers = #tpu.dot_dimension_numbers<[2], [1], [1], [2], [0, 0, 0, 1, 1, 2], [0], [0]>} : vector<4x8x8xbf16>, vector<4x8x8xbf16>, vector<4x8x8xf32> -> vector<4x8x8xf32>
    "tpu.trace_stop"() : () -> ()
    %64 = vector.shape_cast %63 : vector<4x8x8xf32> to vector<1x4x8x8xf32>
    %65 = tpu.transpose %64, [0, 2, 1, 3] : vector<1x4x8x8xf32> -> vector<1x8x4x8xf32>
    %66 = vector.shape_cast %65 : vector<1x8x4x8xf32> to vector<8x32xf32>
    %67 = arith.truncf %66 : vector<8x32xf32> to vector<8x32xbf16>
    %c0_22 = arith.constant 0 : index
    %c0_23 = arith.constant 0 : index
    %c0_24 = arith.constant 0 : index
    %68 = vector.load %arg6[%c0_22, %c0_23, %c0_24] : memref<1x32x32xbf16, #tpu.memory_space<vmem>>, vector<1x32x32xbf16>
    %69 = vector.shape_cast %68 : vector<1x32x32xbf16> to vector<32x32xbf16>
    %cst_25 = arith.constant dense<0.000000e+00> : vector<8x32xf32>
    %70 = tpu.matmul %67, %69, %cst_25 {dimension_numbers = #tpu.dot_dimension_numbers<[1], [0], [0], [1], [0, 0, 1, 1], [], []>} : vector<8x32xbf16>, vector<32x32xbf16>, vector<8x32xf32> -> vector<8x32xf32>
    %71 = arith.addf %3, %70 : vector<8x32xf32>
    %c0_26 = arith.constant 0 : index
    %c0_27 = arith.constant 0 : index
    %c0_28 = arith.constant 0 : index
    %72 = vector.load %arg7[%c0_26, %c0_27, %c0_28] : memref<1x1x32xf32, #tpu.memory_space<vmem>>, vector<1x1x32xf32>
    %73 = vector.shape_cast %72 : vector<1x1x32xf32> to vector<1x32xf32>
    %c0_29 = arith.constant 0 : index
    %c0_30 = arith.constant 0 : index
    %c0_31 = arith.constant 0 : index
    %74 = vector.load %arg8[%c0_29, %c0_30, %c0_31] : memref<1x1x32xf32, #tpu.memory_space<vmem>>, vector<1x1x32xf32>
    %75 = vector.shape_cast %74 : vector<1x1x32xf32> to vector<1x32xf32>
    %cst_32 = arith.constant dense<0.000000e+00> : vector<8xf32>
    %76 = vector.multi_reduction <add>, %71, %cst_32 [1] : vector<8x32xf32> to vector<8xf32>
    %77 = vector.shape_cast %76 : vector<8xf32> to vector<8x1xf32>
    %cst_33 = arith.constant 3.200000e+01 : f32
    %78 = vector.broadcast %cst_33 : f32 to vector<8x1xf32>
    %79 = arith.divf %77, %78 : vector<8x1xf32>
    %80 = vector.broadcast %79 : vector<8x1xf32> to vector<8x32xf32>
    %81 = arith.subf %71, %80 : vector<8x32xf32>
    %82 = arith.mulf %81, %81 : vector<8x32xf32>
    %cst_34 = arith.constant dense<0.000000e+00> : vector<8xf32>
    %83 = vector.multi_reduction <add>, %82, %cst_34 [1] : vector<8x32xf32> to vector<8xf32>
    %84 = vector.shape_cast %83 : vector<8xf32> to vector<8x1xf32>
    %cst_35 = arith.constant 3.200000e+01 : f32
    %85 = vector.broadcast %cst_35 : f32 to vector<8x1xf32>
    %86 = arith.divf %84, %85 : vector<8x1xf32>
    %cst_36 = arith.constant 9.99999974E-6 : f32
    %87 = vector.broadcast %cst_36 : f32 to vector<8x1xf32>
    %88 = arith.addf %86, %87 : vector<8x1xf32>
    %89 = math.rsqrt %88 : vector<8x1xf32>
    %90 = vector.broadcast %89 : vector<8x1xf32> to vector<8x32xf32>
    %91 = arith.mulf %81, %90 : vector<8x32xf32>
    %92 = vector.broadcast %73 : vector<1x32xf32> to vector<8x32xf32>
    %93 = arith.mulf %91, %92 : vector<8x32xf32>
    %94 = vector.broadcast %75 : vector<1x32xf32> to vector<8x32xf32>
    %95 = arith.addf %93, %94 : vector<8x32xf32>
    %96 = arith.truncf %95 : vector<8x32xf32> to vector<8x32xbf16>
    %c0_37 = arith.constant 0 : index
    %c0_38 = arith.constant 0 : index
    %c0_39 = arith.constant 0 : index
    %97 = vector.load %arg9[%c0_37, %c0_38, %c0_39] : memref<1x32x128xbf16, #tpu.memory_space<vmem>>, vector<1x32x128xbf16>
    %98 = vector.shape_cast %97 : vector<1x32x128xbf16> to vector<32x128xbf16>
    %cst_40 = arith.constant dense<0.000000e+00> : vector<8x128xf32>
    %99 = tpu.matmul %96, %98, %cst_40 {dimension_numbers = #tpu.dot_dimension_numbers<[1], [0], [0], [1], [0, 0, 1, 1], [], []>} : vector<8x32xbf16>, vector<32x128xbf16>, vector<8x128xf32> -> vector<8x128xf32>
    %cst_41 = arith.constant 0.000000e+00 : f32
    %100 = vector.broadcast %cst_41 : f32 to vector<8x128xf32>
    %101 = arith.maximumf %99, %100 : vector<8x128xf32>
    %102 = arith.truncf %101 : vector<8x128xf32> to vector<8x128xbf16>
    %c0_42 = arith.constant 0 : index
    %c0_43 = arith.constant 0 : index
    %c0_44 = arith.constant 0 : index
    %103 = vector.load %arg10[%c0_42, %c0_43, %c0_44] : memref<1x128x32xbf16, #tpu.memory_space<vmem>>, vector<1x128x32xbf16>
    %104 = vector.shape_cast %103 : vector<1x128x32xbf16> to vector<128x32xbf16>
    %cst_45 = arith.constant dense<0.000000e+00> : vector<8x32xf32>
    %105 = tpu.matmul %102, %104, %cst_45 {dimension_numbers = #tpu.dot_dimension_numbers<[1], [0], [0], [1], [0, 0, 1, 1], [], []>} : vector<8x128xbf16>, vector<128x32xbf16>, vector<8x32xf32> -> vector<8x32xf32>
    %106 = arith.addf %71, %105 : vector<8x32xf32>
    %c0_46 = arith.constant 0 : index
    %c0_47 = arith.constant 0 : index
    %107 = vector.load %arg14[%c0_46, %c0_47] : memref<8x32xf32, #tpu.memory_space<vmem>>, vector<8x32xf32>
    tpu.vector_store %arg14[%c0_46, %c0_47], %106 {strides = array<i32>} : memref<8x32xf32, #tpu.memory_space<vmem>>, vector<8x32xf32>,
    %c1_i32 = arith.constant 1 : i32
    %108 = arith.cmpi eq, %arg1, %c1_i32 : i32
    %109 = arith.extui %108 : i1 to i32
    %c0_i32_48 = arith.constant 0 : i32
    %110 = arith.cmpi ne, %109, %c0_i32_48 : i32
    scf.if %110 {
      %c0_49 = arith.constant 0 : index
      %c0_50 = arith.constant 0 : index
      %111 = vector.load %arg11[%c0_49, %c0_50] : memref<1x32xf32, #tpu.memory_space<vmem>>, vector<1x32xf32>
      %c0_51 = arith.constant 0 : index
      %c0_52 = arith.constant 0 : index
      %112 = vector.load %arg12[%c0_51, %c0_52] : memref<1x32xf32, #tpu.memory_space<vmem>>, vector<1x32xf32>
      %cst_53 = arith.constant dense<0.000000e+00> : vector<8xf32>
      %113 = vector.multi_reduction <add>, %106, %cst_53 [1] : vector<8x32xf32> to vector<8xf32>
      %114 = vector.shape_cast %113 : vector<8xf32> to vector<8x1xf32>
      %cst_54 = arith.constant 3.200000e+01 : f32
      %115 = vector.broadcast %cst_54 : f32 to vector<8x1xf32>
      %116 = arith.divf %114, %115 : vector<8x1xf32>
      %117 = vector.broadcast %116 : vector<8x1xf32> to vector<8x32xf32>
      %118 = arith.subf %106, %117 : vector<8x32xf32>
      %119 = arith.mulf %118, %118 : vector<8x32xf32>
      %cst_55 = arith.constant dense<0.000000e+00> : vector<8xf32>
      %120 = vector.multi_reduction <add>, %119, %cst_55 [1] : vector<8x32xf32> to vector<8xf32>
      %121 = vector.shape_cast %120 : vector<8xf32> to vector<8x1xf32>
      %cst_56 = arith.constant 3.200000e+01 : f32
      %122 = vector.broadcast %cst_56 : f32 to vector<8x1xf32>
      %123 = arith.divf %121, %122 : vector<8x1xf32>
      %cst_57 = arith.constant 9.99999974E-6 : f32
      %124 = vector.broadcast %cst_57 : f32 to vector<8x1xf32>
      %125 = arith.addf %123, %124 : vector<8x1xf32>
      %126 = math.rsqrt %125 : vector<8x1xf32>
      %127 = vector.broadcast %126 : vector<8x1xf32> to vector<8x32xf32>
      %128 = arith.mulf %118, %127 : vector<8x32xf32>
      %129 = vector.broadcast %111 : vector<1x32xf32> to vector<8x32xf32>
      %130 = arith.mulf %128, %129 : vector<8x32xf32>
      %131 = vector.broadcast %112 : vector<1x32xf32> to vector<8x32xf32>
      %132 = arith.addf %130, %131 : vector<8x32xf32>
      %133 = arith.truncf %132 : vector<8x32xf32> to vector<8x32xbf16>
      %c0_58 = arith.constant 0 : index
      %c0_59 = arith.constant 0 : index
      %134 = vector.load %arg13[%c0_58, %c0_59] : memref<8x32xbf16, #tpu.memory_space<vmem>>, vector<8x32xbf16>
      tpu.vector_store %arg13[%c0_58, %c0_59], %133 {strides = array<i32>} : memref<8x32xbf16, #tpu.memory_space<vmem>>, vector<8x32xbf16>,
    } else {
    }
    return
  }
  func.func @transform_0(%arg0: i32, %arg1: i32) -> (i32, i32) {
    %c0_i32 = arith.constant 0 : i32
    %c0_i32_0 = arith.constant 0 : i32
    return %arg0, %c0_i32 : i32, i32
  }
  func.func @transform_1(%arg0: i32, %arg1: i32) -> (i32, i32, i32) {
    %c0_i32 = arith.constant 0 : i32
    %c0_i32_0 = arith.constant 0 : i32
    %c0_i32_1 = arith.constant 0 : i32
    return %arg1, %c0_i32, %c0_i32_0 : i32, i32, i32
  }
  func.func @transform_2(%arg0: i32, %arg1: i32) -> (i32, i32, i32) {
    %c0_i32 = arith.constant 0 : i32
    %c0_i32_0 = arith.constant 0 : i32
    %c0_i32_1 = arith.constant 0 : i32
    return %arg1, %c0_i32, %c0_i32_0 : i32, i32, i32
  }
  func.func @transform_3(%arg0: i32, %arg1: i32) -> (i32, i32, i32) {
    %c0_i32 = arith.constant 0 : i32
    %c0_i32_0 = arith.constant 0 : i32
    %c0_i32_1 = arith.constant 0 : i32
    return %arg1, %c0_i32, %c0_i32_0 : i32, i32, i32
  }
  func.func @transform_4(%arg0: i32, %arg1: i32) -> (i32, i32, i32) {
    %c0_i32 = arith.constant 0 : i32
    %c0_i32_0 = arith.constant 0 : i32
    %c0_i32_1 = arith.constant 0 : i32
    return %arg1, %c0_i32, %c0_i32_0 : i32, i32, i32
  }
  func.func @transform_5(%arg0: i32, %arg1: i32) -> (i32, i32, i32) {
    %c0_i32 = arith.constant 0 : i32
    %c0_i32_0 = arith.constant 0 : i32
    %c0_i32_1 = arith.constant 0 : i32
    return %arg1, %c0_i32, %c0_i32_0 : i32, i32, i32
  }
  func.func @transform_6(%arg0: i32, %arg1: i32) -> (i32, i32, i32) {
    %c0_i32 = arith.constant 0 : i32
    %c0_i32_0 = arith.constant 0 : i32
    %c0_i32_1 = arith.constant 0 : i32
    return %arg1, %c0_i32, %c0_i32_0 : i32, i32, i32
  }
  func.func @transform_7(%arg0: i32, %arg1: i32) -> (i32, i32, i32) {
    %c0_i32 = arith.constant 0 : i32
    %c0_i32_0 = arith.constant 0 : i32
    %c0_i32_1 = arith.constant 0 : i32
    return %arg1, %c0_i32, %c0_i32_0 : i32, i32, i32
  }
  func.func @transform_8(%arg0: i32, %arg1: i32) -> (i32, i32, i32) {
    %c0_i32 = arith.constant 0 : i32
    %c0_i32_0 = arith.constant 0 : i32
    %c0_i32_1 = arith.constant 0 : i32
    return %arg1, %c0_i32, %c0_i32_0 : i32, i32, i32
  }
  func.func @transform_9(%arg0: i32, %arg1: i32) -> (i32, i32) {
    %c0_i32 = arith.constant 0 : i32
    %c0_i32_0 = arith.constant 0 : i32
    %c0_i32_1 = arith.constant 0 : i32
    return %c0_i32, %c0_i32_0 : i32, i32
  }
  func.func @transform_10(%arg0: i32, %arg1: i32) -> (i32, i32) {
    %c0_i32 = arith.constant 0 : i32
    %c0_i32_0 = arith.constant 0 : i32
    %c0_i32_1 = arith.constant 0 : i32
    return %c0_i32, %c0_i32_0 : i32, i32
  }
  func.func @transform_11(%arg0: i32, %arg1: i32) -> (i32, i32) {
    %c0_i32 = arith.constant 0 : i32
    %c0_i32_0 = arith.constant 0 : i32
    return %arg0, %c0_i32 : i32, i32
  }
}

</mosaic_0001>

<bundles_post_ra>
// kernel: tpu_custom_call.1
= control target key start
LH: loop header
LB: loop body
LE: loop exit
PB: predicated region body
PF: predicated region fallthrough
CT: control target
= control target key end

     0   :  { %s4261_s0 = inlined_call_operand.hbm [shape: bf16[16,32], index: 0, kind: input, shape index: {}]   ;;  %s4262_s1 = inlined_call_operand.hbm [shape: f32[2,1,32], index: 1, kind: input, shape index: {}]   ;;  %s4263_s2 = inlined_call_operand.hbm [shape: f32[2,1,32], index: 2, kind: input, shape index: {}]   ;;  %s4264_s3 = inlined_call_operand.hbm [shape: bf16[2,32,96], index: 3, kind: input, shape index: {}]   ;;  %s4265_s4 = inlined_call_operand.hbm [shape: bf16[2,32,32], index: 4, kind: input, shape index: {}]   ;;  %s4266_s5 = inlined_call_operand.hbm [shape: f32[2,1,32], index: 5, kind: input, shape index: {}]   ;;  %s4267_s6 = inlined_call_operand.hbm [shape: f32[2,1,32], index: 6, kind: input, shape index: {}]   ;;  %s4268_s7 = inlined_call_operand.hbm [shape: bf16[2,32,128], index: 7, kind: input, shape index: {}]   ;;  %s4269_s8 = inlined_call_operand.hbm [shape: bf16[2,128,32], index: 8, kind: input, shape index: {}]   ;;  %s4270_s9 = inlined_call_operand.hbm [shape: f32[1,32], index: 9, kind: input, shape index: {}]   ;;  %s4271_s10 = inlined_call_operand.hbm [shape: f32[1,32], index: 10, kind: input, shape index: {}]   ;;  %s4272_s11 = inlined_call_operand.hbm [shape: bf16[16,32], index: 11, kind: output, shape index: {}]  }
   0x1   :  { %4317 = sst [smem:[#allocation44_spill]] %s4261_s0 }
   0x2   :  { %4318 = sst [smem:[#allocation45_spill]] %s4262_s1 }
   0x3   :  { %4319 = sst [smem:[#allocation46_spill]] %s4263_s2 }
   0x4   :  { %4320 = sst [smem:[#allocation47_spill]] %s4264_s3 }
   0x5   :  { %4321 = sst [smem:[#allocation48_spill]] %s4265_s4 }
   0x6   :  { %4322 = sst [smem:[#allocation49_spill]] %s4266_s5 }
   0x7   :  { %4323 = sst [smem:[#allocation50_spill]] %s4267_s6 }
   0x8   :  { %4324 = sst [smem:[#allocation51_spill]] %s4268_s7 }
   0x9   :  { %4325 = sst [smem:[#allocation52_spill]] %s4269_s8 }
   0xa   :  { %4326 = sst [smem:[#allocation53_spill]] %s4270_s9 }
   0xb   :  { %4327 = sst [smem:[#allocation54_spill]] %s4271_s10 }
   0xc   :  { %4328 = sst [smem:[#allocation55_spill]] %s4272_s11 }
   0xd   :  { %16 = vsyncpa [#allocation5], 0 }
   0xe   :  { %18 = vsyncpa [#allocation5 + $0x1], 0 }
   0xf   :  { %19 = vsyncpa [#allocation8], 0 }
  0x10   :  { %21 = vsyncpa [#allocation8 + $0x1], 0 }
  0x11   :  { %22 = vsyncpa [#allocation11], 0 }
  0x12   :  { %24 = vsyncpa [#allocation11 + $0x1], 0 }
  0x13   :  { %25 = vsyncpa [#allocation14], 0 }
  0x14   :  { %27 = vsyncpa [#allocation14 + $0x1], 0 }
  0x15   :  { %28 = vsyncpa [#allocation17], 0 }
  0x16   :  { %30 = vsyncpa [#allocation17 + $0x1], 0 }
  0x17   :  { %31 = vsyncpa [#allocation20], 0 }
  0x18   :  { %32 = vsyncpa [#allocation6], 0 }
  0x19   :  { %34 = vsyncpa [#allocation6 + $0x1], 0  ;;  %s3405_s17 = smov 0   ;;  %s3407_s18 = smov 0  }
  0x1a   :  { %s3409_s19 = smov 0   ;;  %s3411_s20 = smov 0  }
  0x1b   :  { %s3413_s21 = smov 0   ;;  %s3415_s22 = smov 0  }
  0x1c   :  { %s3417_s23 = smov 0   ;;  %s3419_s24 = smov 0  }
  0x1d   :  { %s3421_s25 = smov 0   ;;  %s3423_s26 = smov 0  }
  0x1e   :  { %s3425_s27 = smov 0  }
  0x1f LB: > { %4329 = sst [smem:[#allocation30_spill]] %s3280_s18  ;;  %s3459_s28 = sadd.s32 4294967295, %s3316_s27   ;;  %s3316_s27 = sphi %s3425_s27, %s40_s27   ;;  %s3312_s26 = sphi %s3423_s26, %s4408_s26   ;;  %s3308_s25 = sphi %s3421_s25, %s4412_s25   ;;  %s3304_s24 = sphi %s3419_s24, %s4406_s24   ;;  %s3300_s23 = sphi %s3417_s23, %s4411_s23   ;;  %s3296_s22 = sphi %s3415_s22, %s4405_s22   ;;  %s3292_s21 = sphi %s3413_s21, %s4410_s21   ;;  %s3288_s20 = sphi %s3411_s20, %s4409_s20   ;;  %s3284_s19 = sphi %s3409_s19, %s4403_s19   ;;  %s3280_s18 = sphi %s3407_s18, %s4402_s18   ;;  %s3276_s17 = sphi %s3405_s17, %s4401_s17  }
  0x20   : > { %4330 = sst [smem:[#allocation31_spill]] %s3284_s19  ;;  %p4281_p0 = scmp.eq.s32.totalorder %s3316_s27, 0 }
  0x21   : > { %4331 = sst [smem:[#allocation32_spill]] %s3296_s22  ;;  %p4280_p1 = scmp.eq.s32.totalorder %s3459_s28, 0 }
  0x22   : > { %4332 = sst [smem:[#allocation33_spill]] %s3300_s23  ;;  %p92_p2 = scmp.ne.s32.totalorder %s3284_s19, %s3280_s18 }
  0x23   : > { %4333 = sst [smem:[#allocation34_spill]] %s3304_s24  ;;  %p98_p3 = scmp.ne.s32.totalorder %s3280_s18, %s3276_s17 }
  0x24   : > { %4334 = sst [smem:[#allocation35_spill]] %s3312_s26  ;;  %p2428_p5 = scmp.ge.s32.totalorder %s3316_s27, 1 }
  0x25   : > { %4335 = sst [smem:[#allocation36_spill]] %s3459_s28  ;;  %p94_p6 = por %p92_p2, %p4281_p0 }
  0x26   : > { %p3473_p7 = por %p98_p3, %p4280_p1  ;;  %p359_p8 = scmp.lt.s32.totalorder %s3316_s27, 5 }
  0x27   : > { %s3318_s13 = smov [#allocation19]   ;;  %p4279_p10 = scmp.lt.s32.totalorder %s3316_s27, 4 }
  0x28   : > { %s4336_s30 = scalar_select %p3473_p7, 1, 0 }
  0x29   : > { %p3478_p9 = pnand %p2428_p5, %p359_p8  ;;  %s372_s14 = sshll.u32 %s3318_s13, 4  ;;  %s373_s14 = int_to_ptr.vmem [resolvable:$true] %s372_s14 }
  0x2a   : > { %4337 = sst [smem:[#allocation37_spill]] %s4336_s30  ;;  %p3487_p12 = pnand %p4279_p10, %p94_p6 }
  0x2b   : > { %s4338_s12 = scalar_select %p3478_p9, 1, 0 }
  0x2c   : > { %p2662_p11 = pneg %p3478_p9  ;;  %s3498_s17 = sand.u32 1, %s3316_s27  }
  0x2d   : > { %4339 = sst [smem:[#allocation38_spill]] %s4338_s12  ;;  %s3501_s29 = sand.u32 1, %s3284_s19  }
  0x2e   : > { %s4340_s15 = scalar_select %p3487_p12, 1, 0 }
  0x2f   : > { %p3493_p13 = pnand %p2662_p11, %p4280_p1  ;;  %s4342_s9 = sld [smem:[#allocation53_spill]] }
  0x31   : > { %s4341_s16 = scalar_select %p3493_p13, 1, 0 }
  0x32   : > { %p4286_p3 = pneg %p3493_p13 }
  0x35   : > { %s2848_s24 = scalar_lea.hbm %s4342_s9, 16 }
  0x36   : > { %p2849_p2 = scmp.ne.s32.totalorder %s4342_s9, %s2848_s24  ;;  %p2855_p8 = scmp.lt.u32.totalorder %s2848_s24, %s4342_s9 }
  0x38   : > { %p2851_p5 = pnand %p4286_p3, %p2849_p2 }
  0x3a   : > { %p2852_p6 = pneg %p2851_p5 }
  0x3c   : > { %p2857_p11 = pnand %p2855_p8, %p2852_p6 }
  0x3e   : > { %2860 = shalt.err (!%p2857_p11)
}
  0x3f   : > { %s2861_s8 = scalar_lea.vmem %s373_s14, 16  ;;  %s2868_s11 = scalar_lea.vmem %s373_s14, 32 }
  0x40   : > { %p2862_p10 = scmp.ne.s32.totalorder %s373_s14, %s2861_s8  ;;  %p2869_p0 = scmp.lt.s32.totalorder %s373_s14, %s373_s14 }
  0x41   : > { %p2870_p7 = scmp.lt.s32.totalorder %s2868_s11, %s2861_s8 }
  0x42   : > { %p2864_p4 = pnand %p2862_p10, %p4286_p3 }
  0x43   : > { %p2871_p9 = por %p2870_p7, %p2869_p0 }
  0x44   : > { %p2865_p1 = pneg %p2864_p4 }
  0x46   : > { %p2872_p12 = pnand %p2871_p9, %p2865_p1 }
  0x48   : > { %2875 = shalt.err (!%p2872_p12)
}
  0x49   : > { %2665 = dma.hbm_to_vmem [thread:$0]  (!%p3493_p13), %s4342_s9, 16, %s373_s14, [#allocation20]  }
  0x4a   : > { %s3526_s24 = sshll.u32 %s3308_s25, 4  ;;  %s4343_s1 = sld [smem:[#allocation45_spill]] }
  0x4b   : > { %s415_s13 = scalar_lea.vmem [#allocation7], %s3501_s29  ;;  %p4344_p1 = scmp.ne.s32.totalorder %s4340_s15, 0 }
  0x4c   : > { %s422_s11 = sshll.u32 %s415_s13, 4  ;;  %s3535_s11 = int_to_ptr.vmem [resolvable:$true] %s422_s11 }
  0x4d   : > { %p3542_p4 = pneg %p4344_p1 }
  0x4f   : > { %s4345_s14 = scalar_select %p3542_p4, 1, 0 }
  0x50   : > { %s3532_s8 = scalar_lea.hbm %s4343_s1, %s3526_s24  ;;  %s2881_s9 = scalar_lea.hbm %s4343_s1, 32 }
  0x51   : > { %s2876_s18 = scalar_lea.hbm %s3532_s8, 16  ;;  %p2882_p10 = scmp.lt.u32.totalorder %s3532_s8, %s4343_s1 }
  0x52   : > { %p2877_p0 = scmp.ne.s32.totalorder %s3532_s8, %s2876_s18  ;;  %p2883_p12 = scmp.lt.u32.totalorder %s2881_s9, %s2876_s18 }
  0x53   : > { %p2885_p5 = scmp.lt.u32.totalorder %s2876_s18, %s3532_s8 }
  0x54   : > { %p2879_p7 = pnand %p3542_p4, %p2877_p0  ;;  %p2884_p2 = por %p2883_p12, %p2882_p10 }
  0x56   : > { %p2880_p9 = pneg %p2879_p7  ;;  %p2886_p6 = por %p2885_p5, %p2884_p2 }
  0x58   : > { %p2887_p8 = pnand %p2886_p6, %p2880_p9 }
  0x5a   : > { %2890 = shalt.err (!%p2887_p8)
}
  0x5b   : > { %s2891_s23 = scalar_lea.vmem %s3535_s11, 16  ;;  %s3319_s30 = smov [#allocation7]  }
  0x5c   : > { %p2892_p11 = scmp.ne.s32.totalorder %s3535_s11, %s2891_s23  ;;  %s2896_s12 = sshll.u32 %s3319_s30, 4  ;;  %s2897_s12 = int_to_ptr.vmem [resolvable:$false] %s2896_s12 }
  0x5d   : > { %s2898_s6 = scalar_lea.vmem %s2897_s12, 32  ;;  %p2899_p3 = scmp.lt.s32.totalorder %s3535_s11, %s2897_s12 }
  0x5e   : > { %p2894_p0 = pnand %p2892_p11, %p3542_p4  ;;  %p2900_p13 = scmp.lt.s32.totalorder %s2898_s6, %s2891_s23 }
  0x60   : > { %p2895_p7 = pneg %p2894_p0  ;;  %p2901_p10 = por %p2900_p13, %p2899_p3 }
  0x62   : > { %p2902_p12 = pnand %p2901_p10, %p2895_p7 }
  0x64   : > { %2905 = shalt.err (!%p2902_p12)
}
  0x65   : > { %s4346_s9 = scalar_lea.sflag [#allocation8], %s3498_s17  ;;  %s3568_s18 = sshll.u32 %s3501_s29, 4 }
  0x66   : > { %2675 = dma.hbm_to_vmem [thread:$0]  (!%p4344_p1), %s3532_s8, 16, %s3535_s11, %s4346_s9  }
  0x67   : > { %s3571_s13 = sshll.u32 %s3308_s25, 8  ;;  %s4347_s3 = sld [smem:[#allocation47_spill]] }
  0x68   : > { %s450_s6 = scalar_lea.vmem [#allocation10], %s3568_s18  ;;  %s4294_s8 = scalar_lea.sflag [#allocation11], %s3498_s17 }
  0x69   : > { %s457_s1 = sshll.u32 %s450_s6, 4  ;;  %s3580_s1 = int_to_ptr.vmem [resolvable:$true] %s457_s1 }
  0x6d   : > { %s3577_s12 = scalar_lea.hbm %s4347_s3, %s3571_s13  ;;  %s2911_s23 = scalar_lea.hbm %s4347_s3, 512 }
  0x6e   : > { %s2906_s11 = scalar_lea.hbm %s3577_s12, 256  ;;  %p2912_p2 = scmp.lt.u32.totalorder %s3577_s12, %s4347_s3 }
  0x6f   : > { %p2907_p13 = scmp.ne.s32.totalorder %s3577_s12, %s2906_s11  ;;  %p2913_p5 = scmp.lt.u32.totalorder %s2911_s23, %s2906_s11 }
  0x70   : > { %p2915_p8 = scmp.lt.u32.totalorder %s2906_s11, %s3577_s12 }
  0x71   : > { %p2909_p3 = pnand %p2907_p13, %p3542_p4  ;;  %p2914_p6 = por %p2913_p5, %p2912_p2 }
  0x73   : > { %p2910_p9 = pneg %p2909_p3  ;;  %p2916_p11 = por %p2915_p8, %p2914_p6 }
  0x75   : > { %p2917_p0 = pnand %p2916_p11, %p2910_p9 }
  0x77   : > { %2920 = shalt.err (!%p2917_p0)
}
  0x78   : > { %s2921_s6 = scalar_lea.vmem %s3580_s1, 256  ;;  %s3320_s4 = smov [#allocation10]  }
  0x79   : > { %p2922_p7 = scmp.ne.s32.totalorder %s3580_s1, %s2921_s6  ;;  %s2926_s9 = sshll.u32 %s3320_s4, 4  ;;  %s2927_s9 = int_to_ptr.vmem [resolvable:$false] %s2926_s9 }
  0x7a   : > { %s2928_s2 = scalar_lea.vmem %s2927_s9, 512  ;;  %p2929_p13 = scmp.lt.s32.totalorder %s3580_s1, %s2927_s9 }
  0x7b   : > { %p2924_p10 = pnand %p2922_p7, %p3542_p4  ;;  %p2930_p3 = scmp.lt.s32.totalorder %s2928_s2, %s2921_s6 }
  0x7d   : > { %p2925_p12 = pneg %p2924_p10  ;;  %p2931_p2 = por %p2930_p3, %p2929_p13 }
  0x7f   : > { %p2932_p5 = pnand %p2931_p2, %p2925_p12 }
  0x81   : > { %2935 = shalt.err (!%p2932_p5)
}
  0x82   : > { %s4295_s11 = smov 64   ;;  %s4303_s23 = smov 4  }
  0x83   : > { %2681 = dma.hbm_to_vmem [thread:$0]  (!%p4344_p1), %s3577_s12, 256, %s3580_s1, %s4294_s8, %s4295_s11, %s4295_s11, %s4303_s23  }
  0x84   : > { %s4348_s5 = sld [smem:[#allocation49_spill]]  ;;  %s491_s9 = scalar_lea.vmem [#allocation13], %s3501_s29 }
  0x85   : > { %s498_s2 = sshll.u32 %s491_s9, 4  ;;  %s4298_s3 = scalar_lea.sflag [#allocation14], %s3498_s17  ;;  %s499_s2 = int_to_ptr.vmem [resolvable:$true] %s498_s2 }
  0x8a   : > { %s3613_s4 = scalar_lea.hbm %s4348_s5, %s3526_s24  ;;  %s2941_s12 = scalar_lea.hbm %s4348_s5, 32 }
  0x8b   : > { %s2936_s0 = scalar_lea.hbm %s3613_s4, 16  ;;  %p2942_p11 = scmp.lt.u32.totalorder %s3613_s4, %s4348_s5 }
  0x8c   : > { %p2937_p9 = scmp.ne.s32.totalorder %s3613_s4, %s2936_s0  ;;  %p2943_p0 = scmp.lt.u32.totalorder %s2941_s12, %s2936_s0 }
  0x8d   : > { %p2945_p10 = scmp.lt.u32.totalorder %s2936_s0, %s3613_s4 }
  0x8e   : > { %p2939_p6 = pnand %p2937_p9, %p3542_p4  ;;  %p2944_p7 = por %p2943_p0, %p2942_p11 }
  0x90   : > { %p2940_p8 = pneg %p2939_p6  ;;  %p2946_p12 = por %p2945_p10, %p2944_p7 }
  0x92   : > { %p2947_p13 = pnand %p2946_p12, %p2940_p8 }
  0x94   : > { %2950 = shalt.err (!%p2947_p13)
}
  0x95   : > { %s2951_s9 = scalar_lea.vmem %s499_s2, 16  ;;  %s3323_s8 = smov [#allocation13]  }
  0x96   : > { %p2952_p3 = scmp.ne.s32.totalorder %s499_s2, %s2951_s9  ;;  %s2956_s11 = sshll.u32 %s3323_s8, 4  ;;  %s2957_s11 = int_to_ptr.vmem [resolvable:$false] %s2956_s11 }
  0x97   : > { %s2958_s19 = scalar_lea.vmem %s2957_s11, 32  ;;  %p2959_p9 = scmp.lt.s32.totalorder %s499_s2, %s2957_s11 }
  0x98   : > { %p2954_p2 = pnand %p2952_p3, %p3542_p4  ;;  %p2960_p6 = scmp.lt.s32.totalorder %s2958_s19, %s2951_s9 }
  0x9a   : > { %p2955_p5 = pneg %p2954_p2  ;;  %p2961_p1 = por %p2960_p6, %p2959_p9 }
  0x9c   : > { %p2962_p0 = pnand %p2961_p1, %p2955_p5 }
  0x9e   : > { %2965 = shalt.err (!%p2962_p0)
}
  0x9f   : > { %p4349_p11 = scmp.ne.s32.totalorder %s4340_s15, 0  ;;  %s4350_s7 = sld [smem:[#allocation51_spill]] }
  0xa0   : > { %s526_s11 = scalar_lea.vmem [#allocation16], %s3568_s18  ;;  %s3324_s30 = smov [#allocation21]  }
  0xa1   : > { %2687 = dma.hbm_to_vmem [thread:$0]  (!%p4349_p11), %s3613_s4, 16, %s499_s2, %s4298_s3  }
  0xa2   : > { %s533_s12 = sshll.u32 %s526_s11, 4  ;;  %s3645_s6 = sshll.u32 %s3324_s30, 4  ;;  %s3643_s12 = int_to_ptr.vmem [resolvable:$true] %s533_s12  ;;  %s384_s6 = int_to_ptr.vmem [resolvable:$true] %s3645_s6 }
  0xa3   : > { %s4302_s9 = scalar_lea.sflag [#allocation17], %s3498_s17 }
  0xa5   : > { %s3640_s8 = scalar_lea.hbm %s4350_s7, %s3571_s13  ;;  %s2971_s0 = scalar_lea.hbm %s4350_s7, 512 }
  0xa6   : > { %s2966_s19 = scalar_lea.hbm %s3640_s8, 256  ;;  %p2972_p10 = scmp.lt.u32.totalorder %s3640_s8, %s4350_s7 }
  0xa7   : > { %p2967_p1 = scmp.ne.s32.totalorder %s3640_s8, %s2966_s19  ;;  %p2973_p12 = scmp.lt.u32.totalorder %s2971_s0, %s2966_s19 }
  0xa8   : > { %p2975_p3 = scmp.lt.u32.totalorder %s2966_s19, %s3640_s8 }
  0xa9   : > { %p2969_p8 = pnand %p2967_p1, %p3542_p4  ;;  %p2974_p13 = por %p2973_p12, %p2972_p10 }
  0xab   : > { %p2970_p7 = pneg %p2969_p8  ;;  %p2976_p2 = por %p2975_p3, %p2974_p13 }
  0xad   : > { %p2977_p5 = pnand %p2976_p2, %p2970_p7 }
  0xaf   : > { %2980 = shalt.err (!%p2977_p5)
}
  0xb0   : > { %s2981_s11 = scalar_lea.vmem %s3643_s12, 256  ;;  %s3325_s30 = smov [#allocation16]  }
  0xb1   : > { %p2982_p9 = scmp.ne.s32.totalorder %s3643_s12, %s2981_s11  ;;  %s2986_s4 = sshll.u32 %s3325_s30, 4  ;;  %s2987_s4 = int_to_ptr.vmem [resolvable:$false] %s2986_s4 }
  0xb2   : > { %s2988_s3 = scalar_lea.vmem %s2987_s4, 512  ;;  %p2989_p1 = scmp.lt.s32.totalorder %s3643_s12, %s2987_s4 }
  0xb3   : > { %p2984_p6 = pnand %p2982_p9, %p3542_p4  ;;  %p2990_p8 = scmp.lt.s32.totalorder %s2988_s3, %s2981_s11 }
  0xb5   : > { %p2985_p0 = pneg %p2984_p6  ;;  %p2991_p10 = por %p2990_p8, %p2989_p1 }
  0xb7   : > { %p2992_p12 = pnand %p2991_p10, %p2985_p0 }
  0xb9   : > { %2995 = shalt.err (!%p2992_p12)
}
  0xba   : > { %s4351_s19 = smov 64   ;;  %s4352_s10 = sld [smem:[#allocation54_spill]] }
  0xbb   : > { %2693 = dma.hbm_to_vmem [thread:$0]  (!%p4349_p11), %s3640_s8, 256, %s3643_s12, %s4302_s9, %s4351_s19, %s4351_s19, %s4303_s23  }
  0xbc   : > { %p4353_p13 = scmp.ne.s32.totalorder %s4341_s16, 0 }
  0xbe   : > { %p4354_p3 = pneg %p4353_p13 }
  0xc0   : > { %s2996_s1 = scalar_lea.hbm %s4352_s10, 16 }
  0xc1   : > { %p2997_p7 = scmp.ne.s32.totalorder %s4352_s10, %s2996_s1  ;;  %p3003_p9 = scmp.lt.u32.totalorder %s2996_s1, %s4352_s10 }
  0xc3   : > { %p2999_p2 = pnand %p2997_p7, %p4354_p3 }
  0xc5   : > { %p3000_p5 = pneg %p2999_p2 }
  0xc7   : > { %p3005_p6 = pnand %p3003_p9, %p3000_p5 }
  0xc9   : > { %3008 = shalt.err (!%p3005_p6)
}
  0xca   : > { %s3009_s8 = scalar_lea.vmem %s384_s6, 16  ;;  %p4355_p1 = pmov %p4354_p3 }
  0xcb   : > { %p3010_p0 = scmp.ne.s32.totalorder %s384_s6, %s3009_s8  ;;  %s3016_s12 = scalar_lea.vmem %s384_s6, 32 }
  0xcc   : > { %p3017_p12 = scmp.lt.s32.totalorder %s384_s6, %s384_s6  ;;  %p3018_p11 = scmp.lt.s32.totalorder %s3016_s12, %s3009_s8 }
  0xcd   : > { %p3012_p8 = pnand %p3010_p0, %p4355_p1 }
  0xce   : > { %p3019_p4 = por %p3018_p11, %p3017_p12 }
  0xcf   : > { %p3013_p10 = pneg %p3012_p8 }
  0xd1   : > { %p3020_p3 = pnand %p3019_p4, %p3013_p10 }
  0xd3   : > { %3023 = shalt.err (!%p3020_p3)
}
  0xd4   : > { %2668 = dma.hbm_to_vmem [thread:$0]  (!%p4353_p13), %s4352_s10, 16, %s384_s6, [#allocation20]  }
  0xd5   : > { %s2427_s16 = sadd.s32 4294967294, %s3316_s27   ;;  %s4356_s1 = sld [smem:[#allocation31_spill]] }
  0xd6   : > { %s49_s11 = sadd.s32 1, %s3308_s25  ;;  %s52_s30 = sadd.s32 1, %s3312_s26 }
  0xd7   : > { %p50_p4 = scmp.ge.s32.totalorder %s49_s11, 2  ;;  %s59_s4 = sadd.s32 1, %s3296_s22 }
  0xd8   : > { %p66_p11 = scmp.ne.s32.totalorder %s3296_s22, %s3292_s21  ;;  %p72_p7 = scmp.ne.s32.totalorder %s3292_s21, %s3288_s20 }
  0xd9   : > { %s4414_s11 = smov (%p50_p4, %s49_s11), 0  ;;  %s4416_s30 = smov (!%p50_p4, %s52_s30), %s3312_s26 }
  0xda   : > { %4357 = sst [smem:[#allocation39_spill]] %s4414_s11  ;;  %p4358_p2 = scmp.eq.s32.totalorder %s3316_s27, 0 }
  0xdb   : > { %p4360_p5 = scmp.eq.s32.totalorder %s3459_s28, 0  ;;  %p54_p6 = scmp.ge.s32.totalorder %s4416_s30, 2 }
  0xdc   : > { %p3708_p13 = por %p4358_p2, %p66_p11  ;;  %s82_s8 = ssub.s32 %s3308_s25, %s4414_s11 }
  0xdd   : > { %p3717_p9 = por %p4360_p5, %p72_p7  ;;  %p83_p0 = scmp.eq.s32.totalorder %s82_s8, 0 }
  0xde   : > { %p4362_p1 = scmp.eq.s32.totalorder %s3459_s28, 3  ;;  %s4418_s30 = smov (%p54_p6, %s4416_s30), 0 }
  0xdf   : > { %s4361_s3 = scalar_select %p3717_p9, 1, 0 }
  0xe0   : > { %p3725_p8 = por %p4362_p1, %p66_p11  ;;  %4365 = sst [smem:[#allocation41_spill]] %s4418_s30 }
  0xe1   : > { %s4366_s2 = sadd.s32 1, %s4356_s1  ;;  %s56_s0 = ssub.s32 %s3312_s26, %s4418_s30 }
  0xe2   : > { %s4363_s12 = scalar_select %p3725_p8, 1, 0 }
  0xe3   : > { %s4420_s1 = smov (!%p83_p0, %s4356_s1), %s4366_s2  ;;  %p352_p10 = scmp.eq.s32.totalorder %s2427_s16, 3 }
  0xe4   : > { %4364 = sst [smem:[#allocation40_spill]] %s4363_s12  ;;  %p57_p12 = scmp.eq.s32.totalorder %s56_s0, 0 }
  0xe5   : > { %4367 = sst [smem:[#allocation42_spill]] %s4420_s1  ;;  %s394_s9 = sand.u32 1, %s3296_s22  }
  0xe6   : > { %p3742_p3 = por %p352_p10, %p72_p7  ;;  %s2432_s5 = sshll.u32 %s394_s9, 2 }
  0xe7   : > { %s3747_s8 = scalar_select %p57_p12, %s3296_s22, %s59_s4  }
  0xe8   : > { %s4368_s23 = scalar_select %p3742_p3, 1, 0 }
  0xe9   : > { %4369 = sst [smem:[#allocation43_spill]] %s3747_s8  ;;  %s2433_s7 = sshll.u32 %s3312_s26, 6 }
  0xea   : > { %s4370_s12 = sld [smem:[#allocation44_spill]]  ;;  %s398_s16 = scalar_lea.vmem [#allocation4], %s2432_s5 }
  0xeb   : > { %s405_s2 = sshll.u32 %s398_s16, 4  ;;  %p4371_p4 = scmp.lt.s32.totalorder %s3316_s27, 4  ;;  %s3763_s2 = int_to_ptr.vmem [resolvable:$true] %s405_s2 }
  0xec   : > { %s395_s30 = scalar_lea.sflag [#allocation5], %s394_s9 }
  0xed   : > { %p3759_p11 = pnand %p4371_p4, %p3708_p13 }
  0xef   : > { %p3026_p2 = pneg %p3759_p11 }
  0xf0   : > { %s3753_s28 = scalar_lea.hbm %s4370_s12, %s2433_s7  ;;  %s4373_s7 = sld [smem:[#allocation46_spill]] }
  0xf1   : > { %s3024_s26 = scalar_lea.hbm %s3753_s28, 64  ;;  %s3029_s16 = scalar_lea.hbm %s4370_s12, 128 }
  0xf2   : > { %p3025_p7 = scmp.ne.s32.totalorder %s3753_s28, %s3024_s26  ;;  %p3030_p6 = scmp.lt.u32.totalorder %s3753_s28, %s4370_s12 }
  0xf3   : > { %p3031_p0 = scmp.lt.u32.totalorder %s3029_s16, %s3024_s26  ;;  %p3033_p10 = scmp.lt.u32.totalorder %s3024_s26, %s3753_s28 }
  0xf4   : > { %p3027_p13 = pnand %p3026_p2, %p3025_p7 }
  0xf5   : > { %p3032_p1 = por %p3031_p0, %p3030_p6 }
  0xf6   : > { %s3769_s11 = scalar_lea.hbm %s4373_s7, %s3526_s24  ;;  %p3028_p5 = pneg %p3027_p13 }
  0xf7   : > { %p3034_p12 = por %p3033_p10, %p3032_p1 }
  0xf9   : > { %p3035_p4 = pnand %p3034_p12, %p3028_p5 }
  0xfb   : > { %3038 = shalt.err (!%p3035_p4)
}
  0xfc   : > { %s3039_s9 = scalar_lea.vmem %s3763_s2, 64  ;;  %s3326_s4 = smov [#allocation4]  }
  0xfd   : > { %p3040_p7 = scmp.ne.s32.totalorder %s3763_s2, %s3039_s9  ;;  %s3044_s10 = sshll.u32 %s3326_s4, 4  ;;  %s3045_s10 = int_to_ptr.vmem [resolvable:$false] %s3044_s10 }
  0xfe   : > { %s3046_s22 = scalar_lea.vmem %s3045_s10, 128  ;;  %p3047_p8 = scmp.lt.s32.totalorder %s3763_s2, %s3045_s10 }
  0xff   : > { %p3042_p13 = pnand %p3040_p7, %p3026_p2  ;;  %p3048_p6 = scmp.lt.s32.totalorder %s3046_s22, %s3039_s9 }
 0x101   : > { %p3043_p3 = pneg %p3042_p13  ;;  %p3049_p0 = por %p3048_p6, %p3047_p8 }
 0x103   : > { %p3050_p1 = pnand %p3049_p0, %p3043_p3 }
 0x105   : > { %3053 = shalt.err (!%p3050_p1)
}
 0x106   : > { %2672 = dma.hbm_to_vmem [thread:$0]  (!%p3759_p11), %s3753_s28, 64, %s3763_s2, %s395_s30  }
 0x107   : > { %s432_s26 = scalar_lea.vmem [#allocation9], %s3501_s29  ;;  %s4374_s16 = sld [smem:[#allocation48_spill]] }
 0x108   : > { %s439_s8 = sshll.u32 %s432_s26, 4  ;;  %s3054_s4 = scalar_lea.hbm %s3769_s11, 16  ;;  %s440_s8 = int_to_ptr.vmem [resolvable:$true] %s439_s8 }
 0x109   : > { %p3055_p8 = scmp.ne.s32.totalorder %s3769_s11, %s3054_s4  ;;  %p4375_p3 = scmp.ne.s32.totalorder %s4345_s14, 0 }
 0x10a   : > { %s3059_s22 = scalar_lea.hbm %s4373_s7, 32  ;;  %p3060_p11 = scmp.lt.u32.totalorder %s3769_s11, %s4373_s7 }
 0x10b   : > { %p3057_p2 = pnand %p3055_p8, %p4375_p3  ;;  %p3061_p10 = scmp.lt.u32.totalorder %s3059_s22, %s3054_s4 }
 0x10c   : > { %p3063_p4 = scmp.lt.u32.totalorder %s3054_s4, %s3769_s11 }
 0x10d   : > { %s3801_s9 = scalar_lea.hbm %s4374_s16, %s3571_s13  ;;  %p3058_p5 = pneg %p3057_p2 }
 0x10e   : > { %p3062_p12 = por %p3061_p10, %p3060_p11 }
 0x110   : > { %p3064_p7 = por %p3063_p4, %p3062_p12 }
 0x112   : > { %p3065_p13 = pnand %p3064_p7, %p3058_p5 }
 0x114   : > { %3068 = shalt.err (!%p3065_p13)
}
 0x115   : > { %s3069_s28 = scalar_lea.vmem %s440_s8, 16  ;;  %s3327_s13 = smov [#allocation9]  }
 0x116   : > { %p3070_p6 = scmp.ne.s32.totalorder %s440_s8, %s3069_s28  ;;  %s3074_s30 = sshll.u32 %s3327_s13, 4  ;;  %s3075_s30 = int_to_ptr.vmem [resolvable:$false] %s3074_s30 }
 0x117   : > { %s3076_s2 = scalar_lea.vmem %s3075_s30, 32  ;;  %p3077_p8 = scmp.lt.s32.totalorder %s440_s8, %s3075_s30 }
 0x118   : > { %p3072_p0 = pnand %p3070_p6, %p4375_p3  ;;  %p3078_p2 = scmp.lt.s32.totalorder %s3076_s2, %s3069_s28 }
 0x11a   : > { %p3073_p1 = pneg %p3072_p0  ;;  %p3079_p9 = por %p3078_p2, %p3077_p8 }
 0x11c   : > { %p3080_p10 = pnand %p3079_p9, %p3073_p1 }
 0x11e   : > { %3083 = shalt.err (!%p3080_p10)
}
 0x11f   : > { %p4376_p11 = scmp.ne.s32.totalorder %s4340_s15, 0  ;;  %s4377_s1 = scalar_lea.sflag [#allocation8], %s3498_s17 }
 0x120   : > { %s471_s12 = scalar_lea.vmem [#allocation12], %s3568_s18  ;;  %s4378_s4 = sld [smem:[#allocation50_spill]] }
 0x121   : > { %2678 = dma.hbm_to_vmem [thread:$0]  (!%p4376_p11), %s3769_s11, 16, %s440_s8, %s4377_s1  }
 0x122   : > { %s478_s26 = sshll.u32 %s471_s12, 4  ;;  %s3084_s10 = scalar_lea.hbm %s3801_s9, 256  ;;  %s3823_s26 = int_to_ptr.vmem [resolvable:$true] %s478_s26 }
 0x123   : > { %p3085_p9 = scmp.ne.s32.totalorder %s3801_s9, %s3084_s10  ;;  %s3089_s13 = scalar_lea.hbm %s4374_s16, 512 }
 0x124   : > { %p3090_p4 = scmp.lt.u32.totalorder %s3801_s9, %s4374_s16  ;;  %p3091_p7 = scmp.lt.u32.totalorder %s3089_s13, %s3084_s10 }
 0x125   : > { %p3087_p5 = pnand %p3085_p9, %p4375_p3  ;;  %p3093_p6 = scmp.lt.u32.totalorder %s3084_s10, %s3801_s9 }
 0x126   : > { %s3829_s0 = scalar_lea.hbm %s4378_s4, %s3526_s24  ;;  %p3092_p13 = por %p3091_p7, %p3090_p4 }
 0x127   : > { %p3088_p12 = pneg %p3087_p5 }
 0x128   : > { %p3094_p0 = por %p3093_p6, %p3092_p13 }
 0x12a   : > { %p3095_p1 = pnand %p3094_p0, %p3088_p12 }
 0x12c   : > { %3098 = shalt.err (!%p3095_p1)
}
 0x12d   : > { %s3099_s24 = scalar_lea.vmem %s3823_s26, 256  ;;  %s3328_s18 = smov [#allocation12]  }
 0x12e   : > { %p3100_p8 = scmp.ne.s32.totalorder %s3823_s26, %s3099_s24  ;;  %s3104_s8 = sshll.u32 %s3328_s18, 4  ;;  %s3105_s8 = int_to_ptr.vmem [resolvable:$false] %s3104_s8 }
 0x12f   : > { %s3106_s2 = scalar_lea.vmem %s3105_s8, 512  ;;  %p3107_p9 = scmp.lt.s32.totalorder %s3823_s26, %s3105_s8 }
 0x130   : > { %p3102_p2 = pnand %p3100_p8, %p4375_p3  ;;  %p3108_p5 = scmp.lt.s32.totalorder %s3106_s2, %s3099_s24 }
 0x132   : > { %p3103_p10 = pneg %p3102_p2  ;;  %p3109_p4 = por %p3108_p5, %p3107_p9 }
 0x134   : > { %p3110_p7 = pnand %p3109_p4, %p3103_p10 }
 0x136   : > { %3113 = shalt.err (!%p3110_p7)
}
 0x137   : > { %s4379_s1 = smov 4   ;;  %s4380_s12 = scalar_lea.sflag [#allocation11], %s3498_s17 }
 0x138   : > { %2684 = dma.hbm_to_vmem [thread:$0]  (!%p4376_p11), %s3801_s9, 256, %s3823_s26, %s4380_s12, %s4351_s19, %s4351_s19, %s4379_s1  }
 0x139   : > { %s508_s5 = scalar_lea.vmem [#allocation15], %s3501_s29  ;;  %s2447_s10 = sshll.u32 %s3501_s29, 6 }
 0x13a   : > { %s515_s6 = sshll.u32 %s508_s5, 4  ;;  %s3114_s22 = scalar_lea.hbm %s3829_s0, 16  ;;  %s516_s6 = int_to_ptr.vmem [resolvable:$true] %s515_s6 }
 0x13b   : > { %p3115_p12 = scmp.ne.s32.totalorder %s3829_s0, %s3114_s22  ;;  %s3119_s30 = scalar_lea.hbm %s4378_s4, 32 }
 0x13c   : > { %p3120_p0 = scmp.lt.u32.totalorder %s3829_s0, %s4378_s4  ;;  %p3121_p1 = scmp.lt.u32.totalorder %s3119_s30, %s3114_s22 }
 0x13d   : > { %p3117_p13 = pnand %p3115_p12, %p4375_p3  ;;  %p3123_p2 = scmp.lt.u32.totalorder %s3114_s22, %s3829_s0 }
 0x13e   : > { %p3122_p8 = por %p3121_p1, %p3120_p0 }
 0x13f   : > { %p3118_p6 = pneg %p3117_p13 }
 0x140   : > { %p3124_p10 = por %p3123_p2, %p3122_p8 }
 0x142   : > { %p3125_p9 = pnand %p3124_p10, %p3118_p6 }
 0x144   : > { %3128 = shalt.err (!%p3125_p9)
}
 0x145   : > { %s3129_s9 = scalar_lea.vmem %s516_s6, 16  ;;  %s3329_s26 = smov [#allocation15]  }
 0x146   : > { %p3130_p5 = scmp.ne.s32.totalorder %s516_s6, %s3129_s9  ;;  %s3134_s18 = sshll.u32 %s3329_s26, 4  ;;  %s3135_s18 = int_to_ptr.vmem [resolvable:$false] %s3134_s18 }
 0x147   : > { %s3136_s8 = scalar_lea.vmem %s3135_s18, 32  ;;  %p3137_p12 = scmp.lt.s32.totalorder %s516_s6, %s3135_s18 }
 0x148   : > { %p3132_p4 = pnand %p3130_p5, %p4375_p3  ;;  %p3138_p13 = scmp.lt.s32.totalorder %s3136_s8, %s3129_s9 }
 0x14a   : > { %p3133_p7 = pneg %p3132_p4  ;;  %p3139_p11 = por %p3138_p13, %p3137_p12 }
 0x14c   : > { %p3140_p0 = pnand %p3139_p11, %p3133_p7 }
 0x14e   : > { %3143 = shalt.err (!%p3140_p0)
}
 0x14f   : > { %p4381_p1 = scmp.ne.s32.totalorder %s4340_s15, 0  ;;  %s4382_s2 = scalar_lea.sflag [#allocation14], %s3498_s17 }
 0x150   : > { %s2507_s12 = sshll.u32 %s3308_s25, 10  ;;  %s547_s5 = scalar_lea.vmem [#allocation18], %s2447_s10 }
 0x151   : > { %2690 = dma.hbm_to_vmem [thread:$0]  (!%p4381_p1), %s3829_s0, 16, %s516_s6, %s4382_s2  }
 0x152   : > { %s554_s22 = sshll.u32 %s547_s5, 4  ;;  %s4383_s30 = sld [smem:[#allocation52_spill]]  ;;  %s3886_s22 = int_to_ptr.vmem [resolvable:$true] %s554_s22 }
 0x158   : > { %s3884_s11 = scalar_lea.hbm %s4383_s30, %s2507_s12  ;;  %s3149_s6 = scalar_lea.hbm %s4383_s30, 2048 }
 0x159   : > { %s3144_s24 = scalar_lea.hbm %s3884_s11, 1024  ;;  %p3150_p2 = scmp.lt.u32.totalorder %s3884_s11, %s4383_s30 }
 0x15a   : > { %p3145_p11 = scmp.ne.s32.totalorder %s3884_s11, %s3144_s24  ;;  %p3151_p10 = scmp.lt.u32.totalorder %s3149_s6, %s3144_s24 }
 0x15b   : > { %p3153_p5 = scmp.lt.u32.totalorder %s3144_s24, %s3884_s11 }
 0x15c   : > { %p3147_p6 = pnand %p3145_p11, %p4375_p3  ;;  %p3152_p9 = por %p3151_p10, %p3150_p2 }
 0x15e   : > { %p3148_p8 = pneg %p3147_p6  ;;  %p3154_p4 = por %p3153_p5, %p3152_p9 }
 0x160   : > { %p3155_p7 = pnand %p3154_p4, %p3148_p8 }
 0x162   : > { %3158 = shalt.err (!%p3155_p7)
}
 0x163   : > { %s3159_s26 = scalar_lea.vmem %s3886_s22, 1024  ;;  %s3330_s18 = smov [#allocation18]  }
 0x164   : > { %p3160_p12 = scmp.ne.s32.totalorder %s3886_s22, %s3159_s26  ;;  %s3164_s8 = sshll.u32 %s3330_s18, 4  ;;  %s3165_s8 = int_to_ptr.vmem [resolvable:$false] %s3164_s8 }
 0x165   : > { %s3166_s2 = scalar_lea.vmem %s3165_s8, 2048  ;;  %p3167_p11 = scmp.lt.s32.totalorder %s3886_s22, %s3165_s8 }
 0x166   : > { %p3162_p13 = pnand %p3160_p12, %p4375_p3  ;;  %p3168_p6 = scmp.lt.s32.totalorder %s3166_s2, %s3159_s26 }
 0x168   : > { %p3163_p0 = pneg %p3162_p13  ;;  %p3169_p2 = por %p3168_p6, %p3167_p11 }
 0x16a   : > { %p3170_p10 = pnand %p3169_p2, %p3163_p0 }
 0x16c   : > { %3173 = shalt.err (!%p3170_p10)
}
 0x16d   : > { %s4384_s12 = scalar_lea.sflag [#allocation17], %s3498_s17  ;;  %s4385_s14 = sld [smem:[#allocation38_spill]] }
 0x16e   : > { %2696 = dma.hbm_to_vmem [thread:$0]  (!%p4381_p1), %s3884_s11, 1024, %s3886_s22, %s4384_s12, %s4351_s19, %s4351_s19, %s4379_s1  }
 0x173   : > { %p4386_p3 = scmp.ne.s32.totalorder %s4385_s14, 0 }
 0x174   : > { %s3917_s5 = sand.u32 (!%p4386_p3), 1, %s3292_s21   ;;  %p4387_p8 = scmp.ne.s32.totalorder (!%p4386_p3), %s4361_s3, 0 }
 0x175   : > { %566 = sbr.rel (%p4386_p3) target bundleno = 3460 (0xd84), region = 64  ;;  %s2451_s28 = sshll.u32 (!%p4386_p3), %s3917_s5, 2 }
 0x176   : > { %s569_s15 = scalar_lea.sflag (!%p4386_p3), [#allocation5], %s3917_s5  ;;  %s3923_s13 = scalar_lea.vmem (!%p4386_p3), [#allocation4], %s2451_s28 }
 0x17c   : > { %3247 = dma.done.wait (%p4387_p8), %s569_s15, 64  }
 0x17d   : > { %3249 = vsyncadd (%p4387_p8), %s569_s15, 4294967232  ;;  %s4388_s17 = sld [smem:[#allocation36_spill]]  ;;  %s4389_s19 = sld [smem:[#allocation30_spill]] }
 0x17e   : > { %s4390_s1 = sld [smem:[#allocation37_spill]] }
 0x183   : > { %s577_s22 = sand.u32 1, %s4388_s17   ;;  %s3931_s11 = sand.u32 1, %s4389_s19  }
 0x184   : > { %s578_s24 = scalar_lea.sflag [#allocation8], %s577_s22  ;;  %s580_s0 = scalar_lea.vmem [#allocation7], %s3931_s11 }
 0x185   : > { %p4391_p1 = scmp.ne.s32.totalorder %s4390_s1, 0 }
 0x187   : > { %3251 = dma.done.wait (%p4391_p1), %s578_s24, 32  }
 0x188   : > { %3253 = vsyncadd (%p4391_p1), %s578_s24, 4294967264  ;;  %s3939_s29 = sshll.u32 %s3931_s11, 4  ;;  %s588_s3 = scalar_lea.vmem [#allocation9], %s3931_s11 }
 0x189   : > { %s594_s6 = scalar_lea.sflag [#allocation11], %s577_s22  ;;  %s597_s10 = scalar_lea.vmem [#allocation10], %s3939_s29 }
 0x18a   : > { %3255 = dma.done.wait (%p4391_p1), %s594_s6, 512  }
 0x18b   : > { %3257 = vsyncadd (%p4391_p1), %s594_s6, 4294966784  ;;  %s606_s9 = scalar_lea.vmem [#allocation12], %s3939_s29  ;;  %s612_s26 = scalar_lea.sflag [#allocation14], %s577_s22 }
 0x18c   : > { %s614_s18 = scalar_lea.vmem [#allocation13], %s3931_s11 }
 0x18d   : > { %3259 = dma.done.wait (%p4391_p1), %s612_s26, 32  }
 0x18e   : > { %3261 = vsyncadd (%p4391_p1), %s612_s26, 4294967264  ;;  %s622_s8 = scalar_lea.vmem [#allocation15], %s3931_s11  ;;  %s628_s2 = scalar_lea.sflag [#allocation17], %s577_s22 }
 0x18f   : > { %s631_s12 = scalar_lea.vmem [#allocation16], %s3939_s29 }
 0x190   : > { %3263 = dma.done.wait (%p4391_p1), %s628_s2, 1280  }
 0x191   : > { %3265 = vsyncadd (%p4391_p1), %s628_s2, 4294966016  ;;  %s2455_s14 = sshll.u32 %s3931_s11, 6  ;;  %p4392_p9 = scmp.eq.s32.totalorder %s4388_s17, 0 }
 0x192   : > { %s3960_s15 = scalar_lea.vmem [#allocation18], %s2455_s14 }
 0x193   : > { %3267 = dma.done.wait (%p4392_p9), [#allocation20], 32   ;;  %p4393_p5 = pmov %p4392_p9 }
 0x194   : > { %s3968_s19 = scalar_lea.vmem [#allocation22], %s2451_s28  ;;  %s4394_s22 = sld [smem:[#allocation33_spill]] }
 0x195   : > { %3269 = vsyncadd (%p4393_p5), [#allocation20], 4294967264 }
 0x19a   : > { %p2459_p4 = scmp.ne.s32.totalorder %s4394_s22, 0 }
 0x19b   : > { %v728_v0 = vld [vmem:[%s3923_s13] sm:$0xf] (!%p2459_p4)  ;;  %vm730_vm0 = vcmask (!%p2459_p4), 261120   ;;  %v732_v1 = vlaneseq (!%p2459_p4)  ;;  %vm738_vm1 = vcmask (!%p2459_p4), 64512   ;;  %v3331_v5 = vmov (!%p2459_p4), -1e+30  }
 0x19c   : > { %727 = sbr.rel (%p2459_p4) target bundleno = 419 (0x1a3), region = 112  ;;  %v729_v2 = vunpack.c.l.bf16 (!%p2459_p4), %v728_v0 }
 0x19d   : > { %v733_v3 = vshrl.u32 (!%p2459_p4), %v732_v1, 7  ;;  %v735_v4 = vand.u32 (!%p2459_p4), 127, %v732_v1 }
 0x19e   : > { %731 = vst.msk [vmem:[#allocation2] sm:$0xff] (!%p2459_p4), %vm730_vm0, %v729_v2 }
 0x19f   : > { %vm736_vm2 = vcmp.le.s32.totalorder (!%p2459_p4), %v735_v4, %v733_v3 }
 0x1a0   : > { %v737_v6 = vsel (!%p2459_p4), %vm736_vm2, 0.0, %v3331_v5 }
 0x1a1   : > { %739 = vst.msk [vmem:[#allocation3] sm:$0xff] (!%p2459_p4), %vm738_vm1, %v737_v6 }
 0x1a3 PF: > { %vm743_vm3 = vcmask 261120   ;;  %v2812_v14 = vld [vmem:[%s597_s10] sm:$0xff]   ;;  %v3332_v15 = vmov 0.0   ;;  %vm3333_vm4 = vmmov 0   ;;  %v2813_v16 = vld [vmem:[%s597_s10 + $0x8] sm:$0xff]   ;;  %s3334_s28 = smov 104   ;;  %v847_v36 = vlaneseq }
 0x1a4   : > { %2542 = vmatprep.subr.bf16.mxu0 %v3332_v15  ;;  %2546 = vmatprep.mubr.msk.bf16.mxu0 %vm3333_vm4, %v3332_v15  ;;  %v2460_v21 = vld [vmem:[%s580_s0] ss:$0 sm:$0xff]  ;;  %s3335_s13 = smov 120   ;;  %s3336_s17 = smov 112   ;;  %v3338_v34 = vmov 1983009808  }
 0x1a5   : > { %v3972_v7 = vld [vmem:[#allocation2] sm:$0xff]  ;;  %2543 = vmatpush3.bf16.msra.mxu0 %v2812_v14  ;;  %2562 = vmatprep.subr.bf16.mxu1 %v3332_v15  ;;  %s3337_s1 = smov 96   ;;  %v845_v35 = vunpack.c.l.s4 %v3338_v34  ;;  %v848_v38 = vshrl.u32 %v847_v36, 7  ;;  %v3339_v40 = vmov 1934713408   ;;  %vm1287_vm5 = vcmask 64512  }
 0x1a6   : > { %v744_v8 = vsel %vm743_vm3, %v3972_v7, 0.0  ;;  %2544 = vmatprep.subr.bf16.mxu0 %v3332_v15  ;;  %2564 = vmatprep.mubr.msk.bf16.mxu1 %vm3333_vm4, %v3332_v15  ;;  %v2461_v23 = vld [vmem:[%s588_s3] ss:$0 sm:$0xff]  ;;  %v877_v41 = vunpack.c.l.s4 %v3339_v40  ;;  %s3340_s24 = smov 64   ;;  %vm1523_vm6 = vcmask 1043456   ;;  %s3341_s0 = smov 16  }
 0x1a7   : > { %745 = vadd.xlane.f32.xlu0 %v744_v8  ;;  %v846_v37 = vunpack.c.0.s8 %v845_v35  ;;  %s3342_s3 = smov 8   ;;  %s3343_s6 = smov 24   ;;  %vm1854_vm7 = vcmask 130048   ;;  %vm1856_vm8 = vcmask 195584  }
 0x1a8   : > { %v878_v48 = vunpack.c.0.s8 %v877_v41  ;;  %s4395_s11 = sld [smem:[#allocation33_spill]] }
 0x1a9   : > { %2545 = vmatpush3.bf16.msra.mxu0 %v2813_v16  ;;  %v4016_v44 = vsub.s32 %v846_v37, %v848_v38 }
 0x1aa   : > { %2550 = vmatprep.subr.bf16.mxu0 %v3332_v15  ;;  %v4026_v54 = vsub.s32 %v878_v48, %v848_v38 }
 0x1ae   : > { %p2497_p7 = scmp.ne.s32.totalorder %s4395_s11, 1 }
 0x1af   : > { %vm2150_vm9 = vcmask (!%p2497_p7), 257024  }
 0x234   : > { %v746_v9 = vpop.xlane.xlu0 %745 }
 0x235   : > { %v748_v10 = vmul.f32 0.03125, %v746_v9 }
 0x237   : > { %v749_v11 = vsub.f32 %v3972_v7, %v748_v10 }
 0x239   : > { %v750_v12 = vmul.f32 %v749_v11, %v749_v11 }
 0x23b   : > { %v751_v13 = vsel %vm743_vm3, %v750_v12, 0.0 }
 0x23c   : > { %752 = vadd.xlane.f32.xlu0 %v751_v13 }
 0x2c9   : > { %v753_v17 = vpop.xlane.xlu0 %752 }
 0x2ca   : > { %v754_v18 = vmul.f32 0.03125, %v753_v17 }
 0x2cc   : > { %v755_v19 = vadd.f32 1e-05, %v754_v18 }
 0x2ce   : > { %2826 = vrsqrt.f32 %v755_v19 }
 0x2d8   : > { %v2827_v20 = vpop.eup %2826 }
 0x2d9   : > { %v757_v22 = vmul.f32 %v2827_v20, %v749_v11 }
 0x2db   : > { %v764_v24 = vmul.f32 %v2460_v21, %v757_v22 }
 0x2dd   : > { %v771_v25 = vadd.f32 %v2461_v23, %v764_v24 }
 0x2df   : > { %v772_v26 = vpack.c.bf16 %v771_v25, %v771_v25 }
 0x2e1   : > { %2547 = vmatmul.mubr.msk.bf16.vlgmr.msra.gmra.mrb[0].mxu0 %vm743_vm3, %v772_v26 }
 0x2e2   : > { %2552 = vmatprep.mubr.msk.bf16.mxu0 %vm3333_vm4, %v3332_v15 }
 0x3b4   : > { %v3997_v27 = vpop.f32.mrb[0].mxu0 }
 0x3b5   : > { %839 = vrot.lane.b32.xlu0 %v3997_v27, %s3334_s28  ;;  %833 = vrot.lane.b32.xlu1 %v3997_v27, %s3335_s13  ;;  %v2548_v28 = vpop.f32.mrb[1].mxu0 }
 0x3b6   : > { %v829_v29 = vpop.f32.mrb[2].mxu0 }
 0x3b7   : > { %v2549_v30 = vpop.f32.mrb[3].mxu0 }
 0x3b9   : > { %836 = vrot.lane.b32.xlu1 %v3997_v27, %s3336_s17 }
 0x3bd   : > { %982 = vrot.lane.b32.xlu1 %v3997_v27, %s3337_s1 }
 0x427   : > { %v4003_v31 = vpop.permute.xlu1 %833  ;;  %v4009_v33 = vpop.permute.xlu0 %839 }
 0x428   : > { %984 = vrot.lane.b32.xlu1 %v4003_v31, %s3337_s1  ;;  %v858_v45 = vcombine.low %v4003_v31, %v4009_v33  ;;  %v859_v46 = vcombine.high %v4003_v31, %v4009_v33 }
 0x42a   : > { %v866_v51 = vrot.slane %v858_v45, %v4016_v44  ;;  %v873_v52 = vrot.slane %v859_v46, %v4016_v44 }
 0x42b   : > { %v4006_v32 = vpop.permute.xlu1 %836 }
 0x42c   : > { %986 = vrot.lane.b32.xlu1 %v4006_v32, %s3337_s1  ;;  %v842_v42 = vcombine.low %v3997_v27, %v4006_v32  ;;  %v843_v43 = vcombine.high %v3997_v27, %v4006_v32 }
 0x42e   : > { %v850_v49 = vrot.slane %v842_v42, %v4016_v44  ;;  %v857_v50 = vrot.slane %v843_v43, %v4016_v44 }
 0x42f   : > { %v983_v39 = vpop.permute.xlu1 %982 }
 0x430   : > { %988 = vrot.lane.b32.xlu1 %v4009_v33, %s3337_s1  ;;  %v874_v55 = vcombine.low %v850_v49, %v866_v51  ;;  %v875_v56 = vcombine.high %v850_v49, %v866_v51  ;;  %v890_v57 = vcombine.low %v857_v50, %v873_v52  ;;  %v891_v58 = vcombine.high %v857_v50, %v873_v52 }
 0x432   : > { %v882_v0 = vrot.slane %v874_v55, %v4026_v54  ;;  %v889_v1 = vrot.slane %v875_v56, %v4026_v54  ;;  %v898_v2 = vrot.slane %v890_v57, %v4026_v54  ;;  %v905_v3 = vrot.slane %v891_v58, %v4026_v54 }
 0x434   : > { %v910_v13 = vcombine.low %v882_v0, %v889_v1  ;;  %v2465_v14 = vcombine.high %v882_v0, %v889_v1  ;;  %v926_v16 = vcombine.low %v898_v2, %v905_v3  ;;  %v2466_v17 = vcombine.high %v898_v2, %v905_v3 }
 0x436   : > { %v917_v26 = vrot.slane %v910_v13, %v4016_v44  ;;  %v925_v28 = vrot.slane %v2465_v14, %v4016_v44  ;;  %v933_v29 = vrot.slane %v926_v16, %v4016_v44  ;;  %v941_v30 = vrot.slane %v2466_v17, %v4016_v44  ;;  %v1286_v13 = vld [vmem:[#allocation3] sm:$0xff] }
 0x438   : > { %v942_v42 = vcombine.low %v917_v26, %v925_v28  ;;  %v958_v43 = vcombine.low %v933_v29, %v941_v30  ;;  %v943_v45 = vcombine.high %v917_v26, %v925_v28  ;;  %v959_v46 = vcombine.high %v933_v29, %v941_v30 }
 0x43a   : > { %v966_v55 = vrot.slane %v958_v43, %v4026_v54  ;;  %v957_v58 = vrot.slane %v943_v45, %v4026_v54 }
 0x49a   : > { %v985_v47 = vpop.permute.xlu1 %984 }
 0x49e   : > { %v987_v53 = vpop.permute.xlu1 %986 }
 0x49f   : > { %v994_v59 = vcombine.low %v983_v39, %v987_v53  ;;  %v995_v60 = vcombine.high %v983_v39, %v987_v53  ;;  %v950_v53 = vrot.slane %v942_v42, %v4026_v54 }
 0x4a1   : > { %v1002_v4 = vrot.slane %v994_v59, %v4016_v44  ;;  %v1009_v5 = vrot.slane %v995_v60, %v4016_v44  ;;  %v973_v59 = vrot.slane %v959_v46, %v4026_v54 }
 0x4a2   : > { %v989_v61 = vpop.permute.xlu1 %988 }
 0x4a3   : > { %v1010_v62 = vcombine.low %v985_v47, %v989_v61  ;;  %v1011_v63 = vcombine.high %v985_v47, %v989_v61  ;;  %v976_v0 = vcombine.low %v957_v58, %v973_v59 }
 0x4a5   : > { %v1018_v6 = vrot.slane %v1010_v62, %v4016_v44  ;;  %v1025_v8 = vrot.slane %v1011_v63, %v4016_v44  ;;  %v974_v63 = vcombine.low %v950_v53, %v966_v55  ;;  %v980_v3 = vpack.c.bf16 %v976_v0, %v976_v0 }
 0x4a7   : > { %v1026_v9 = vcombine.low %v1002_v4, %v1018_v6  ;;  %v1027_v10 = vcombine.high %v1002_v4, %v1018_v6  ;;  %v1042_v11 = vcombine.low %v1009_v5, %v1025_v8  ;;  %v1043_v12 = vcombine.high %v1009_v5, %v1025_v8 }
 0x4a8   : > { %v978_v2 = vpack.c.bf16 %v974_v63, %v974_v63  ;;  %v975_v6 = vcombine.high %v950_v53, %v966_v55 }
 0x4a9   : > { %v1034_v18 = vrot.slane %v1026_v9, %v4026_v54  ;;  %v1041_v19 = vrot.slane %v1027_v10, %v4026_v54  ;;  %v1050_v20 = vrot.slane %v1042_v11, %v4026_v54  ;;  %v1057_v21 = vrot.slane %v1043_v12, %v4026_v54 }
 0x4aa   : > { %v979_v9 = vpack.c.bf16 %v975_v6, %v975_v6  ;;  %v977_v11 = vcombine.high %v957_v58, %v973_v59 }
 0x4ab   : > { %v1062_v22 = vcombine.low %v1034_v18, %v1041_v19  ;;  %v2467_v23 = vcombine.high %v1034_v18, %v1041_v19  ;;  %v1078_v24 = vcombine.low %v1050_v20, %v1057_v21  ;;  %v2468_v25 = vcombine.high %v1050_v20, %v1057_v21 }
 0x4ac   : > { %v981_v12 = vpack.c.bf16 %v977_v11, %v977_v11 }
 0x4ad   : > { %v1069_v34 = vrot.slane %v1062_v22, %v4016_v44  ;;  %v1077_v35 = vrot.slane %v2467_v23, %v4016_v44  ;;  %v1085_v36 = vrot.slane %v1078_v24, %v4016_v44  ;;  %v1093_v37 = vrot.slane %v2468_v25, %v4016_v44 }
 0x4af   : > { %v1094_v38 = vcombine.low %v1069_v34, %v1077_v35  ;;  %v1110_v39 = vcombine.low %v1085_v36, %v1093_v37  ;;  %v1095_v40 = vcombine.high %v1069_v34, %v1077_v35  ;;  %v1111_v41 = vcombine.high %v1085_v36, %v1093_v37 }
 0x4b1   : > { %v1102_v47 = vrot.slane %v1094_v38, %v4026_v54  ;;  %v1118_v48 = vrot.slane %v1110_v39, %v4026_v54  ;;  %v1109_v49 = vrot.slane %v1095_v40, %v4026_v54  ;;  %v1125_v50 = vrot.slane %v1111_v41, %v4026_v54 }
 0x4b3   : > { %v1126_v51 = vcombine.low %v1102_v47, %v1118_v48  ;;  %v1128_v52 = vcombine.low %v1109_v49, %v1125_v50  ;;  %v1127_v62 = vcombine.high %v1102_v47, %v1118_v48  ;;  %v1129_v5 = vcombine.high %v1109_v49, %v1125_v50 }
 0x4b5   : > { %v1130_v56 = vpack.c.bf16 %v1126_v51, %v1126_v51  ;;  %v1132_v57 = vpack.c.bf16 %v1128_v52, %v1128_v52  ;;  %v1131_v1 = vpack.c.bf16 %v1127_v62, %v1127_v62  ;;  %v1133_v8 = vpack.c.bf16 %v1129_v5, %v1129_v5 }
 0x4b7   : > { %v1292_v60 = vsel %vm1287_vm5, %v1130_v56, 0  ;;  %v1384_v61 = vsel %vm1287_vm5, %v1132_v57, 0  ;;  %v1338_v4 = vsel %vm1287_vm5, %v1131_v1, 0  ;;  %v1430_v10 = vsel %vm1287_vm5, %v1133_v8, 0 }
 0x4b8   : > { %2551 = vmatpush3.bf16.xpose.msra.mxu0 %v1292_v60  ;;  %2563 = vmatpush3.bf16.xpose.msra.mxu1 %v1384_v61 }
 0x4b9   : > { %2556 = vmatprep.subr.bf16.mxu0 %v3332_v15  ;;  %2574 = vmatprep.subr.bf16.mxu1 %v3332_v15 }
 0x4bf   : > { %2553 = vmatmul.mubr.msk.bf16.vlgmr.msra.gmra.mrb[4].mxu0 %vm1287_vm5, %v978_v2  ;;  %2565 = vmatmul.mubr.msk.bf16.vlgmr.msra.gmra.mrb[0].mxu1 %vm1287_vm5, %v980_v3 }
 0x4c0   : > { %2557 = vmatpush3.bf16.xpose.msra.mxu0 %v1338_v4  ;;  %2558 = vmatprep.mubr.msk.bf16.mxu0 %vm3333_vm4, %v3332_v15 }
 0x4c1   : > { %2568 = vmatprep.subr.bf16.mxu0 %v3332_v15  ;;  %2576 = vmatprep.mubr.msk.bf16.mxu1 %vm3333_vm4, %v3332_v15 }
 0x4c7   : > { %2559 = vmatmul.mubr.msk.bf16.vlgmr.msra.gmra.mrb[8].mxu0 %vm1287_vm5, %v979_v9 }
 0x4c8   : > { %2569 = vmatpush3.bf16.xpose.msra.mxu0 %v1430_v10  ;;  %2570 = vmatprep.mubr.msk.bf16.mxu0 %vm3333_vm4, %v3332_v15 }
 0x4c9   : > { %2580 = vmatprep.subr.bf16.mxu0 %v3332_v15 }
 0x4cf   : > { %2571 = vmatmul.mubr.msk.bf16.vlgmr.msra.gmra.mrb[12].mxu0 %vm1287_vm5, %v981_v12 }
 0x4d0   : > { %2582 = vmatprep.mubr.msk.bf16.mxu0 %vm3333_vm4, %v3332_v15 }
 0x592   : > { %v1328_v14 = vpop.f32.mrb[4].mxu0  ;;  %v1420_v16 = vpop.f32.mrb[0].mxu1 }
 0x593   : > { %v1329_v17 = vadd.f32 %v1328_v14, %v1286_v13  ;;  %v2554_v18 = vpop.f32.mrb[5].mxu0  ;;  %v2566_v19 = vpop.f32.mrb[1].mxu1  ;;  %v1421_v22 = vadd.f32 %v1420_v16, %v1286_v13 }
 0x594   : > { %v1331_v20 = vpop.f32.mrb[6].mxu0  ;;  %v1423_v21 = vpop.f32.mrb[2].mxu1 }
 0x595   : > { %v2555_v23 = vpop.f32.mrb[7].mxu0  ;;  %v2567_v24 = vpop.f32.mrb[3].mxu1  ;;  %v1472_v25 = vsel %vm1287_vm5, %v1329_v17, -inf  ;;  %v1478_v26 = vsel %vm1287_vm5, %v1421_v22, -inf }
 0x596   : > { %1473 = vmax.xlane.f32.xlu1 %v1472_v25 }
 0x59a   : > { %1479 = vmax.xlane.f32.xlu1 %v1478_v26  ;;  %v1374_v28 = vpop.f32.mrb[8].mxu0 }
 0x59b   : > { %v1375_v29 = vadd.f32 %v1374_v28, %v1286_v13  ;;  %v2560_v30 = vpop.f32.mrb[9].mxu0 }
 0x59c   : > { %v1377_v34 = vpop.f32.mrb[10].mxu0 }
 0x59d   : > { %v2561_v35 = vpop.f32.mrb[11].mxu0  ;;  %v1475_v36 = vsel %vm1287_vm5, %v1375_v29, -inf }
 0x59e   : > { %1476 = vmax.xlane.f32.xlu0 %v1475_v36 }
 0x5a2   : > { %v1466_v37 = vpop.f32.mrb[12].mxu0 }
 0x5a3   : > { %v1467_v38 = vadd.f32 %v1466_v37, %v1286_v13  ;;  %v2572_v39 = vpop.f32.mrb[13].mxu0 }
 0x5a4   : > { %v1469_v40 = vpop.f32.mrb[14].mxu0 }
 0x5a5   : > { %v2573_v41 = vpop.f32.mrb[15].mxu0  ;;  %v1481_v42 = vsel %vm1287_vm5, %v1467_v38, -inf }
 0x5a6   : > { %1482 = vmax.xlane.f32.xlu0 %v1481_v42 }
 0x5ab   : > { %1134 = vrot.lane.b32.xlu1 %v3997_v27, %s3340_s24 }
 0x623   : > { %v1474_v43 = vpop.xlane.xlu1 %1473 }
 0x624   : > { %v1484_v45 = vsub.f32 %v1329_v17, %v1474_v43 }
 0x626   : > { %v1488_v46 = vmul.f32 1.442695, %v1484_v45 }
 0x627   : > { %v1480_v56 = vpop.xlane.xlu1 %1479 }
 0x628   : > { %2828 = vpow2.f32 %v1488_v46  ;;  %v1486_v57 = vsub.f32 %v1421_v22, %v1480_v56 }
 0x62a   : > { %v1492_v59 = vmul.f32 1.442695, %v1486_v57 }
 0x62b   : > { %v1477_v47 = vpop.xlane.xlu0 %1476 }
 0x62c   : > { %v1485_v48 = vsub.f32 %v1375_v29, %v1477_v47 }
 0x62e   : > { %v1490_v49 = vmul.f32 1.442695, %v1485_v48 }
 0x630   : > { %2830 = vpow2.f32 %v1490_v49 }
 0x632   : > { %v4081_v50 = vpop.eup %2828 }
 0x633   : > { %v1496_v51 = vsel %vm1287_vm5, %v4081_v50, 0.0  ;;  %v1483_v27 = vpop.xlane.xlu0 %1482 }
 0x634   : > { %1497 = vadd.xlane.f32.xlu1 %v1496_v51  ;;  %v1487_v55 = vsub.f32 %v1467_v38, %v1483_v27 }
 0x636   : > { %v1494_v58 = vmul.f32 1.442695, %v1487_v55 }
 0x638   : > { %2832 = vpow2.f32 %v1494_v58 }
 0x639   : > { %2834 = vpow2.f32 %v1492_v59 }
 0x63a   : > { %v4085_v52 = vpop.eup %2830 }
 0x63b   : > { %v1499_v53 = vsel %vm1287_vm5, %v4085_v52, 0.0 }
 0x63c   : > { %1500 = vadd.xlane.f32.xlu0 %v1499_v53 }
 0x642   : > { %v4092_v60 = vpop.eup %2832 }
 0x643   : > { %v1505_v61 = vsel %vm1287_vm5, %v4092_v60, 0.0  ;;  %v4096_v62 = vpop.eup %2834 }
 0x645   : > { %1138 = vrot.lane.b32.xlu1 %v4006_v32, %s3340_s24  ;;  %v1502_v32 = vsel %vm1287_vm5, %v4096_v62, 0.0 }
 0x649   : > { %1140 = vrot.lane.b32.xlu1 %v4009_v33, %s3340_s24 }
 0x652   : > { %1136 = vrot.lane.b32.xlu0 %v4003_v31, %s3340_s24  ;;  %v1135_v31 = vpop.permute.xlu1 %1134 }
 0x66d   : > { %1506 = vadd.xlane.f32.xlu1 %v1505_v61 }
 0x671   : > { %1503 = vadd.xlane.f32.xlu0 %v1502_v32 }
 0x6c1   : > { %v1498_v33 = vpop.xlane.xlu1 %1497 }
 0x6c2   : > { %2836 = vrcp.f32 %v1498_v33 }
 0x6c5   : > { %v1139_v63 = vpop.permute.xlu1 %1138 }
 0x6c6   : > { %v1146_v1 = vcombine.low %v1135_v31, %v1139_v63  ;;  %v1147_v2 = vcombine.high %v1135_v31, %v1139_v63 }
 0x6c8   : > { %v1154_v8 = vrot.slane %v1146_v1, %v4016_v44  ;;  %v1161_v9 = vrot.slane %v1147_v2, %v4016_v44 }
 0x6c9   : > { %v1501_v0 = vpop.xlane.xlu0 %1500  ;;  %v1141_v3 = vpop.permute.xlu1 %1140 }
 0x6ca   : > { %2838 = vrcp.f32 %v1501_v0 }
 0x6cc   : > { %v2837_v37 = vpop.eup %2836 }
 0x6cd   : > { %v1137_v4 = vpop.permute.xlu0 %1136  ;;  %v1512_v48 = vmul.f32 %v2837_v37, %v4081_v50 }
 0x6ce   : > { %v1162_v5 = vcombine.low %v1137_v4, %v1141_v3  ;;  %v1163_v6 = vcombine.high %v1137_v4, %v1141_v3 }
 0x6cf   : > { %v1516_v58 = vpack.c.bf16 %v1512_v48, %v1512_v48 }
 0x6d0   : > { %v1170_v10 = vrot.slane %v1162_v5, %v4016_v44  ;;  %v1177_v11 = vrot.slane %v1163_v6, %v4016_v44 }
 0x6d2   : > { %v1178_v12 = vcombine.low %v1154_v8, %v1170_v10  ;;  %v1179_v13 = vcombine.high %v1154_v8, %v1170_v10  ;;  %v1194_v14 = vcombine.low %v1161_v9, %v1177_v11  ;;  %v1195_v16 = vcombine.high %v1161_v9, %v1177_v11 }
 0x6d4   : > { %v1186_v17 = vrot.slane %v1178_v12, %v4026_v54  ;;  %v1193_v18 = vrot.slane %v1179_v13, %v4026_v54  ;;  %v1202_v19 = vrot.slane %v1194_v14, %v4026_v54  ;;  %v1209_v20 = vrot.slane %v1195_v16, %v4026_v54  ;;  %v2839_v42 = vpop.eup %2838 }
 0x6d5   : > { %v1513_v49 = vmul.f32 %v2839_v42, %v4085_v52 }
 0x6d6   : > { %v1214_v21 = vcombine.low %v1186_v17, %v1193_v18  ;;  %v2469_v22 = vcombine.high %v1186_v17, %v1193_v18  ;;  %v1230_v23 = vcombine.low %v1202_v19, %v1209_v20  ;;  %v2470_v24 = vcombine.high %v1202_v19, %v1209_v20 }
 0x6d7   : > { %v1517_v59 = vpack.c.bf16 %v1513_v49, %v1513_v49 }
 0x6d8   : > { %v1221_v25 = vrot.slane %v1214_v21, %v4016_v44  ;;  %v1229_v26 = vrot.slane %v2469_v22, %v4016_v44  ;;  %v1237_v28 = vrot.slane %v1230_v23, %v4016_v44  ;;  %v1245_v29 = vrot.slane %v2470_v24, %v4016_v44 }
 0x6da   : > { %v1246_v30 = vcombine.low %v1221_v25, %v1229_v26  ;;  %v1262_v34 = vcombine.low %v1237_v28, %v1245_v29  ;;  %v1247_v35 = vcombine.high %v1221_v25, %v1229_v26  ;;  %v1263_v36 = vcombine.high %v1237_v28, %v1245_v29  ;;  %v2814_v28 = vld [vmem:[%s606_s9] sm:$0xff]  }
 0x6dc   : > { %v1254_v38 = vrot.slane %v1246_v30, %v4026_v54  ;;  %v1270_v39 = vrot.slane %v1262_v34, %v4026_v54  ;;  %v1261_v40 = vrot.slane %v1247_v35, %v4026_v54  ;;  %v1277_v41 = vrot.slane %v1263_v36, %v4026_v54 }
 0x6de   : > { %v1278_v43 = vcombine.low %v1254_v38, %v1270_v39  ;;  %v1279_v45 = vcombine.high %v1254_v38, %v1270_v39  ;;  %v1280_v46 = vcombine.low %v1261_v40, %v1277_v41  ;;  %v1281_v47 = vcombine.high %v1261_v40, %v1277_v41  ;;  %v2815_v40 = vld [vmem:[%s606_s9 + $0x8] sm:$0xff]  }
 0x6e0   : > { %v1282_v51 = vpack.c.bf16 %v1278_v43, %v1278_v43  ;;  %v1283_v53 = vpack.c.bf16 %v1279_v45, %v1279_v45  ;;  %v1284_v56 = vpack.c.bf16 %v1280_v46, %v1280_v46  ;;  %v1285_v57 = vpack.c.bf16 %v1281_v47, %v1281_v47 }
 0x6e2   : > { %v1525_v27 = vsel %vm1523_vm6, %v1282_v51, 0  ;;  %v1571_v55 = vsel %vm1523_vm6, %v1283_v53, 0  ;;  %v1617_v50 = vsel %vm1523_vm6, %v1284_v56, 0  ;;  %v1663_v52 = vsel %vm1523_vm6, %v1285_v57, 0 }
 0x6e3   : > { %2575 = vmatpush3.bf16.msra.mxu1 %v1525_v27  ;;  %2581 = vmatpush3.bf16.msra.mxu0 %v1571_v55 }
 0x6e4   : > { %2586 = vmatprep.subr.bf16.mxu1 %v3332_v15  ;;  %2592 = vmatprep.subr.bf16.mxu0 %v3332_v15 }
 0x6e6   : > { %2577 = vmatmul.mubr.msk.bf16.vlgmr.msra.gmra.mrb[4].mxu1 %vm1287_vm5, %v1516_v58  ;;  %2583 = vmatmul.mubr.msk.bf16.vlgmr.msra.gmra.mrb[16].mxu0 %vm1287_vm5, %v1517_v59 }
 0x6e7   : > { %2587 = vmatpush3.bf16.msra.mxu1 %v1617_v50  ;;  %2593 = vmatpush3.bf16.msra.mxu0 %v1663_v52 }
 0x6e8   : > { %2594 = vmatprep.mubr.msk.bf16.mxu0 %vm3333_vm4, %v3332_v15  ;;  %2588 = vmatprep.mubr.msk.bf16.mxu1 %vm3333_vm4, %v3332_v15 }
 0x6e9   : > { %2598 = vmatprep.subr.bf16.mxu1 %v3332_v15  ;;  %2606 = vmatprep.subr.bf16.mxu0 %v3332_v15 }
 0x6fa   : > { %v1507_v61 = vpop.xlane.xlu1 %1506 }
 0x6fb   : > { %2840 = vrcp.f32 %v1507_v61 }
 0x6fe   : > { %v1504_v32 = vpop.xlane.xlu0 %1503 }
 0x6ff   : > { %2842 = vrcp.f32 %v1504_v32 }
 0x705   : > { %v2841_v31 = vpop.eup %2840 }
 0x706   : > { %v1515_v33 = vmul.f32 %v2841_v31, %v4092_v60 }
 0x708   : > { %v1519_v63 = vpack.c.bf16 %v1515_v33, %v1515_v33 }
 0x709   : > { %v2843_v0 = vpop.eup %2842 }
 0x70a   : > { %v1514_v1 = vmul.f32 %v2843_v0, %v4096_v62  ;;  %2595 = vmatmul.mubr.msk.bf16.vlgmr.msra.gmra.mrb[20].mxu0 %vm1287_vm5, %v1519_v63 }
 0x70b   : > { %2610 = vmatprep.mubr.msk.bf16.mxu0 %vm3333_vm4, %v3332_v15 }
 0x70c   : > { %v1518_v2 = vpack.c.bf16 %v1514_v1, %v1514_v1 }
 0x70e   : > { %2589 = vmatmul.mubr.msk.bf16.vlgmr.msra.gmra.mrb[8].mxu1 %vm1287_vm5, %v1518_v2 }
 0x70f   : > { %2602 = vmatprep.mubr.msk.bf16.mxu1 %vm3333_vm4, %v3332_v15  ;;  %2599 = vmatpush3.bf16.msra.mxu1 %v2814_v28  ;;  %v2485_v28 = vld [vmem:[%s622_s8] ss:$0 sm:$0xff] }
 0x710   : > { %2600 = vmatprep.subr.bf16.mxu1 %v3332_v15 }
 0x713   : > { %2601 = vmatpush3.bf16.msra.mxu1 %v2815_v40 }
 0x714   : > { %2614 = vmatprep.subr.bf16.mxu1 %v3332_v15 }
 0x7b9   : > { %v1561_v3 = vpop.f32.mrb[4].mxu1  ;;  %v1607_v4 = vpop.f32.mrb[16].mxu0 }
 0x7ba   : > { %v2578_v5 = vpop.f32.mrb[5].mxu1  ;;  %v2584_v6 = vpop.f32.mrb[17].mxu0 }
 0x7bb   : > { %v1564_v60 = vpop.f32.mrb[6].mxu1  ;;  %v1610_v8 = vpop.f32.mrb[18].mxu0 }
 0x7bc   : > { %v2579_v9 = vpop.f32.mrb[7].mxu1  ;;  %v2585_v10 = vpop.f32.mrb[19].mxu0 }
 0x7dd   : > { %v1699_v62 = vpop.f32.mrb[20].mxu0 }
 0x7de   : > { %v1721_v11 = vcombine.low %v1607_v4, %v1699_v62  ;;  %v1722_v12 = vcombine.high %v1607_v4, %v1699_v62  ;;  %v2596_v13 = vpop.f32.mrb[21].mxu0 }
 0x7df   : > { %v1702_v14 = vpop.f32.mrb[22].mxu0  ;;  %v2818_v13 = vld [vmem:[%s3960_s15] sm:$0xff]  }
 0x7e0   : > { %v2597_v16 = vpop.f32.mrb[23].mxu0  ;;  %v1729_v22 = vrot.slane %v1721_v11, %v4016_v44  ;;  %v1736_v23 = vrot.slane %v1722_v12, %v4016_v44  ;;  %v2816_v12 = vld [vmem:[%s631_s12] sm:$0xff]   ;;  %v2819_v14 = vld [vmem:[%s3960_s15 + $0x8] sm:$0xff]  }
 0x7e1   : > { %v1653_v17 = vpop.f32.mrb[8].mxu1  ;;  %2607 = vmatpush3.bf16.msra.mxu0 %v2816_v12  ;;  %v2820_v16 = vld [vmem:[%s3960_s15 + $0x10] sm:$0xff]  }
 0x7e2   : > { %v1705_v18 = vcombine.low %v1561_v3, %v1653_v17  ;;  %v1706_v19 = vcombine.high %v1561_v3, %v1653_v17  ;;  %v2590_v20 = vpop.f32.mrb[9].mxu1  ;;  %2608 = vmatprep.subr.bf16.mxu0 %v3332_v15  ;;  %v2821_v17 = vld [vmem:[%s3960_s15 + $0x18] sm:$0xff]  }
 0x7e3   : > { %v1656_v21 = vpop.f32.mrb[10].mxu1  ;;  %v2824_v20 = vld [vmem:[%s3960_s15 + $0x30] sm:$0xff]  }
 0x7e4   : > { %v1713_v24 = vrot.slane %v1705_v18, %v4016_v44  ;;  %v1720_v25 = vrot.slane %v1706_v19, %v4016_v44  ;;  %v2591_v26 = vpop.f32.mrb[11].mxu1  ;;  %v2822_v18 = vld [vmem:[%s3960_s15 + $0x20] sm:$0xff]   ;;  %v2823_v19 = vld [vmem:[%s3960_s15 + $0x28] sm:$0xff]  }
 0x7e6   : > { %v1737_v29 = vcombine.low %v1713_v24, %v1729_v22  ;;  %v1738_v30 = vcombine.high %v1713_v24, %v1729_v22  ;;  %v1753_v34 = vcombine.low %v1720_v25, %v1736_v23  ;;  %v1754_v35 = vcombine.high %v1720_v25, %v1736_v23  ;;  %v2484_v25 = vld [vmem:[%s614_s18] ss:$0 sm:$0xff] }
 0x7e8   : > { %v1745_v36 = vrot.slane %v1737_v29, %v4026_v54  ;;  %v1752_v37 = vrot.slane %v1738_v30, %v4026_v54  ;;  %v1761_v38 = vrot.slane %v1753_v34, %v4026_v54  ;;  %v1768_v39 = vrot.slane %v1754_v35, %v4026_v54  ;;  %v2825_v35 = vld [vmem:[%s3960_s15 + $0x38] sm:$0xff]  }
 0x7ea   : > { %v1773_v41 = vcombine.low %v1745_v36, %v1752_v37  ;;  %v2479_v42 = vcombine.high %v1745_v36, %v1752_v37  ;;  %v1789_v43 = vcombine.low %v1761_v38, %v1768_v39  ;;  %v2480_v45 = vcombine.high %v1761_v38, %v1768_v39 }
 0x7ec   : > { %v1780_v46 = vrot.slane %v1773_v41, %v4016_v44  ;;  %v1788_v47 = vrot.slane %v2479_v42, %v4016_v44  ;;  %v1796_v48 = vrot.slane %v1789_v43, %v4016_v44  ;;  %v1804_v49 = vrot.slane %v2480_v45, %v4016_v44 }
 0x7ee   : > { %v1806_v51 = vcombine.high %v1780_v46, %v1788_v47  ;;  %v1822_v53 = vcombine.high %v1796_v48, %v1804_v49  ;;  %v1805_v27 = vcombine.low %v1780_v46, %v1788_v47  ;;  %v1821_v55 = vcombine.low %v1796_v48, %v1804_v49 }
 0x7f0   : > { %v1820_v56 = vrot.slane %v1806_v51, %v4026_v54  ;;  %v1836_v57 = vrot.slane %v1822_v53, %v4026_v54  ;;  %v1813_v58 = vrot.slane %v1805_v27, %v4026_v54  ;;  %v1829_v59 = vrot.slane %v1821_v55, %v4026_v54 }
 0x7f2   : > { %v1839_v50 = vcombine.low %v1820_v56, %v1836_v57  ;;  %v1838_v52 = vcombine.high %v1813_v58, %v1829_v59  ;;  %v1840_v61 = vcombine.high %v1820_v56, %v1836_v57  ;;  %v1837_v32 = vcombine.low %v1813_v58, %v1829_v59  ;;  %v2498_v59 = vld [vmem:[#allocation19] ss:$0 sm:$0xff] (!%p2497_p7) }
 0x7f4   : > { %1846 = vrot.lane.b32.xlu1 %v1839_v50, %s3341_s0  ;;  %1842 = vrot.lane.b32.xlu0 %v1838_v52, %s3342_s3  ;;  %v2499_v52 = vld [vmem:[#allocation21] ss:$0 sm:$0xff] (!%p2497_p7) }
 0x7f8   : > { %1850 = vrot.lane.b32.xlu0 %v1840_v61, %s3343_s6 }
 0x866   : > { %v1843_v44 = vpop.permute.xlu0 %1842  ;;  %v1847_v31 = vpop.permute.xlu1 %1846 }
 0x867   : > { %v1853_v33 = vsel %vm1287_vm5, %v1837_v32, %v1843_v44 }
 0x868   : > { %v1855_v0 = vsel %vm1854_vm7, %v1853_v33, %v1847_v31 }
 0x86a   : > { %v1851_v63 = vpop.permute.xlu0 %1850 }
 0x86b   : > { %v1857_v1 = vsel %vm1856_vm8, %v1855_v0, %v1851_v63 }
 0x86c   : > { %v1858_v54 = vpack.c.bf16 %v1857_v1, %v1857_v1 }
 0x86e   : > { %2603 = vmatmul.mubr.msk.bf16.vlgmr.msra.gmra.mrb[12].mxu1 %vm743_vm3, %v1858_v54 }
 0x86f   : > { %2630 = vmatprep.mubr.msk.bf16.mxu1 %vm3333_vm4, %v3332_v15  ;;  %2615 = vmatpush3.bf16.msra.mxu1 %v2818_v13 }
 0x870   : > { %2616 = vmatprep.subr.bf16.mxu1 %v3332_v15 }
 0x873   : > { %2617 = vmatpush3.bf16.msra.mxu1 %v2819_v14 }
 0x874   : > { %2618 = vmatprep.subr.bf16.mxu1 %v3332_v15 }
 0x877   : > { %2619 = vmatpush3.bf16.msra.mxu1 %v2820_v16 }
 0x878   : > { %2620 = vmatprep.subr.bf16.mxu1 %v3332_v15 }
 0x87b   : > { %2621 = vmatpush3.bf16.msra.mxu1 %v2821_v17 }
 0x87c   : > { %2622 = vmatprep.subr.bf16.mxu1 %v3332_v15 }
 0x87f   : > { %2623 = vmatpush3.bf16.msra.mxu1 %v2822_v18 }
 0x880   : > { %2624 = vmatprep.subr.bf16.mxu1 %v3332_v15 }
 0x883   : > { %2625 = vmatpush3.bf16.msra.mxu1 %v2823_v19 }
 0x884   : > { %2626 = vmatprep.subr.bf16.mxu1 %v3332_v15 }
 0x887   : > { %2627 = vmatpush3.bf16.msra.mxu1 %v2824_v20 }
 0x888   : > { %2628 = vmatprep.subr.bf16.mxu1 %v3332_v15 }
 0x88b   : > { %2629 = vmatpush3.bf16.msra.mxu1 %v2825_v35 }
 0x941   : > { %v1912_v2 = vpop.f32.mrb[12].mxu1 }
 0x942   : > { %v1918_v3 = vadd.f32 %v1912_v2, %v3972_v7  ;;  %v2604_v4 = vpop.f32.mrb[13].mxu1  ;;  %v2817_v7 = vld [vmem:[%s631_s12 + $0x8] sm:$0xff]  }
 0x943   : > { %v1915_v5 = vpop.f32.mrb[14].mxu1  ;;  %2609 = vmatpush3.bf16.msra.mxu0 %v2817_v7 }
 0x944   : > { %v2605_v6 = vpop.f32.mrb[15].mxu1  ;;  %v1921_v60 = vsel %vm743_vm3, %v1918_v3, 0.0 }
 0x945   : > { %1922 = vadd.xlane.f32.xlu1 %v1921_v60 }
 0x9d2   : > { %v1923_v8 = vpop.xlane.xlu1 %1922 }
 0x9d3   : > { %v1924_v9 = vmul.f32 0.03125, %v1923_v8 }
 0x9d5   : > { %v1925_v10 = vsub.f32 %v1918_v3, %v1924_v9 }
 0x9d7   : > { %v1926_v62 = vmul.f32 %v1925_v10, %v1925_v10 }
 0x9d9   : > { %v1927_v11 = vsel %vm743_vm3, %v1926_v62, 0.0 }
 0x9da   : > { %1928 = vadd.xlane.f32.xlu0 %v1927_v11 }
 0xa67   : > { %v1929_v21 = vpop.xlane.xlu0 %1928 }
 0xa68   : > { %v1930_v22 = vmul.f32 0.03125, %v1929_v21 }
 0xa6a   : > { %v1931_v23 = vadd.f32 1e-05, %v1930_v22 }
 0xa6c   : > { %2844 = vrsqrt.f32 %v1931_v23 }
 0xa76   : > { %v2845_v24 = vpop.eup %2844 }
 0xa77   : > { %v1933_v26 = vmul.f32 %v2845_v24, %v1925_v10 }
 0xa79   : > { %v1940_v29 = vmul.f32 %v2484_v25, %v1933_v26 }
 0xa7b   : > { %v1947_v30 = vadd.f32 %v2485_v28, %v1940_v29 }
 0xa7d   : > { %v1948_v34 = vpack.c.bf16 %v1947_v30, %v1947_v30 }
 0xa7f   : > { %2611 = vmatmul.mubr.msk.bf16.vlgmr.msra.gmra.mrb[24].mxu0 %vm743_vm3, %v1948_v34 }
 0xb52   : > { %v2002_v36 = vpop.f32.mrb[24].mxu0 }
 0xb53   : > { %v2008_v37 = vmax.f32 %v2002_v36, 0.0  ;;  %v2612_v15 = vpop.f32.mrb[25].mxu0 }
 0xb54   : > { %v2005_v38 = vpop.f32.mrb[26].mxu0 }
 0xb55   : > { %v2009_v39 = vpack.c.bf16 %v2008_v37, %v2008_v37  ;;  %v2613_v40 = vpop.f32.mrb[27].mxu0 }
 0xb57   : > { %2631 = vmatmul.mubr.bf16.vlgmr.msra.gmra.mrb[16].mxu1 %v2009_v39 }
 0xc27   : > { %2119 = sbr.rel (%p2497_p7) target bundleno = 3433 (0xd69), region = 116 }
 0xc2a   : > { %v2108_v41 = vpop.f32.mrb[16].mxu1 }
 0xc2b   : > { %v2114_v42 = vadd.f32 %v2108_v41, %v1918_v3  ;;  %v2632_v43 = vpop.f32.mrb[17].mxu1 }
 0xc2c   : > { %v2111_v45 = vpop.f32.mrb[18].mxu1 }
 0xc2d   : > { %2115 = vst.msk [vmem:[#allocation2] sm:$0xff] %vm743_vm3, %v2114_v42  ;;  %v2633_v46 = vpop.f32.mrb[19].mxu1  ;;  %v2122_v47 = vsel (!%p2497_p7), %vm743_vm3, %v2114_v42, 0.0 }
 0xc2e   : > { %2123 = vadd.xlane.f32.xlu0 %v2122_v47 }
 0xcbb   : > { %v2124_v48 = vpop.xlane.xlu0 %2123 }
 0xcbc   : > { %v2125_v49 = vmul.f32 0.03125, %v2124_v48 }
 0xcbe   : > { %v2126_v51 = vsub.f32 %v2114_v42, %v2125_v49 }
 0xcc0   : > { %v2127_v53 = vmul.f32 %v2126_v51, %v2126_v51 }
 0xcc2   : > { %v2128_v27 = vsel %vm743_vm3, %v2127_v53, 0.0 }
 0xcc3   : > { %2129 = vadd.xlane.f32.xlu0 %v2128_v27 }
 0xd50   : > { %v2130_v55 = vpop.xlane.xlu0 %2129 }
 0xd51   : > { %v2131_v56 = vmul.f32 0.03125, %v2130_v55 }
 0xd53   : > { %v2132_v57 = vadd.f32 1e-05, %v2131_v56 }
 0xd55   : > { %2846 = vrsqrt.f32 %v2132_v57 }
 0xd5f   : > { %v2847_v58 = vpop.eup %2846 }
 0xd60   : > { %v2134_v50 = vmul.f32 %v2847_v58, %v2126_v51 }
 0xd62   : > { %v2141_v61 = vmul.f32 %v2498_v59, %v2134_v50 }
 0xd64   : > { %v2148_v32 = vadd.f32 %v2499_v52, %v2141_v61 }
 0xd66   : > { %v2149_v44 = vpack.c.bf16 %v2148_v32, %v2148_v32 }
 0xd68   : > { %2151 = vst.msk [vmem:[%s3968_s19] sm:$0xf] %vm2150_vm9, %v2149_v44 }
 0xd69 PF: > { %s4396_s29 = sld [smem:[#allocation34_spill]]  ;;  %s4397_s10 = sld [smem:[#allocation40_spill]] }
 0xd6a   : > { %s4398_s8 = sld [smem:[#allocation55_spill]]  ;;  %s2166_s12 = sshll.u32 %s3968_s19, 4  ;;  %s2167_s12 = int_to_ptr.vmem [resolvable:$true] %s2166_s12 }
 0xd6b   : > { %s2153_s14 = scalar_lea.sflag [#allocation6], %s3917_s5  ;;  %s3174_s15 = scalar_lea.vmem %s2167_s12, 64 }
 0xd6c   : > { %p3175_p12 = scmp.ne.s32.totalorder %s2167_s12, %s3174_s15  ;;  %s3344_s22 = smov [#allocation22]  }
 0xd6d   : > { %s3178_s28 = sshll.u32 %s3344_s22, 4  ;;  %s3179_s28 = int_to_ptr.vmem [resolvable:$false] %s3178_s28 }
 0xd6e   : > { %s3180_s13 = scalar_lea.vmem %s3179_s28, 128  ;;  %p3181_p6 = scmp.lt.s32.totalorder %s2167_s12, %s3179_s28 }
 0xd6f   : > { %s2501_s9 = sshll.u32 %s4396_s29, 6  ;;  %p4399_p13 = scmp.ne.s32.totalorder %s4397_s10, 0 }
 0xd70   : > { %s4203_s2 = scalar_lea.hbm %s4398_s8, %s2501_s9  ;;  %p3182_p2 = scmp.lt.s32.totalorder %s3180_s13, %s3174_s15 }
 0xd71   : > { %p3176_p0 = pnand %p3175_p12, %p4399_p13 }
 0xd72   : > { %p3183_p10 = por %p3182_p2, %p3181_p6 }
 0xd73   : > { %p3177_p11 = pneg %p3176_p0 }
 0xd75   : > { %p3184_p3 = pnand %p3183_p10, %p3177_p11 }
 0xd77   : > { %3187 = shalt.err (!%p3184_p3)
}
 0xd78   : > { %s3188_s5 = scalar_lea.hbm %s4203_s2, 64  ;;  %s3192_s1 = scalar_lea.hbm %s4398_s8, 128 }
 0xd79   : > { %p3189_p8 = scmp.ne.s32.totalorder %s4203_s2, %s3188_s5  ;;  %p3193_p5 = scmp.lt.u32.totalorder %s4203_s2, %s4398_s8 }
 0xd7a   : > { %p3194_p4 = scmp.lt.u32.totalorder %s3192_s1, %s3188_s5  ;;  %p3196_p12 = scmp.lt.u32.totalorder %s3188_s5, %s4203_s2 }
 0xd7b   : > { %p3190_p1 = pnand %p3189_p8, %p4399_p13 }
 0xd7c   : > { %p3195_p7 = por %p3194_p4, %p3193_p5 }
 0xd7d   : > { %p3191_p9 = pneg %p3190_p1 }
 0xd7e   : > { %p3197_p0 = por %p3196_p12, %p3195_p7 }
 0xd80   : > { %p3198_p11 = pnand %p3197_p0, %p3191_p9 }
 0xd82   : > { %3201 = shalt.err (!%p3198_p11)
}
 0xd83   : > { %2660 = dma.vmem_to_hbm [thread:$0]  (%p4399_p13), %s2167_s12, 64, %s4203_s2, %s2153_s14  }
 0xd84 PF: > { %p2706_p6 = scmp.ge.s32.totalorder %s3316_s27, 2  ;;  %s2178_s3 = sand.u32 1, %s3288_s20  }
 0xd85   : > { %p4400_p2 = scmp.ne.s32.totalorder %s4368_s23, 0  ;;  %s2179_s6 = scalar_lea.sflag [#allocation6], %s2178_s3 }
 0xd87   : > { %p2698_p10 = pnand %p2706_p6, %p4400_p2 }
 0xd89   : > { %3271 = dma.done.wait (!%p2698_p10), %s2179_s6, 64  }
 0xd8a   : > { %3273 = vsyncadd (!%p2698_p10), %s2179_s6, 4294967232  ;;  %s40_s27 = sadd.s32 1, %s3316_s27   ;;  %s4401_s17 = sld [smem:[#allocation30_spill]] }
 0xd8b   : > { %p37_p3 = scmp.ge.s32.totalorder %s40_s27, 6   ;;  %s4402_s18 = sld [smem:[#allocation31_spill]] }
 0xd8c   : > { %s4403_s19 = sld [smem:[#allocation42_spill]]  ;;  %s4404_s11 = sld [smem:[#allocation32_spill]] }
 0xd8d   : > { %s4405_s22 = sld [smem:[#allocation43_spill]]  ;;  %s4406_s24 = sld [smem:[#allocation35_spill]] }
 0xd8e   : > { %s4407_s29 = sld [smem:[#allocation39_spill]]  ;;  %s4408_s26 = sld [smem:[#allocation41_spill]] }
 0xd8f   : > { %s4409_s20 = smov %s3292_s21  ;;  %s4411_s23 = smov %s3308_s25 }
 0xd90   :  { %39 = sbr.rel (!%p37_p3) target bundleno = 31 (0x1f), region = 221 }
 0xd92   : > { %s4410_s21 = smov %s4404_s11 }
 0xd94   : > { %s4412_s25 = smov %s4407_s29 }
 0xd97   :  { %2184 = vsyncpa [#allocation5], 1 }
 0xd98   :  { %2186 = vsyncpa [#allocation5 + $0x1], 1 }
 0xd99   :  { %2187 = vsyncpa [#allocation8], 1 }
 0xd9a   :  { %2189 = vsyncpa [#allocation8 + $0x1], 1 }
 0xd9b   :  { %2190 = vsyncpa [#allocation11], 1 }
 0xd9c   :  { %2192 = vsyncpa [#allocation11 + $0x1], 1 }
 0xd9d   :  { %2193 = vsyncpa [#allocation14], 1 }
 0xd9e   :  { %2195 = vsyncpa [#allocation14 + $0x1], 1 }
 0xd9f   :  { %2196 = vsyncpa [#allocation17], 1 }
 0xda0   :  { %2198 = vsyncpa [#allocation17 + $0x1], 1 }
 0xda1   :  { %2199 = vsyncpa [#allocation20], 1 }
 0xda2   :  { %2200 = vsyncpa [#allocation6], 1 }
 0xda3   :  { %2202 = vsyncpa [#allocation6 + $0x1], 1 }

</bundles_post_ra>
